<compile_context>
chip_gen: v5e
topology: v5e:2x2
jax: 0.10.0
libtpu: 0.0.40
codegen_flags: <defaults>
</compile_context>

<pallas_src>
import functools

import jax
import jax.numpy as jnp
from jax.experimental import pallas as pl
from jax.experimental.pallas import tpu as pltpu


def _round_up(x, m):
    return ((x + m - 1) // m) * m


def _leaky_relu(v, slope=0.2):
    # max(v, slope*v) == leaky_relu for slope in (0,1): one mul + one max.
    return jnp.maximum(v, v * slope)


def generator_kernel(x_ref,
                     w1_ref, b1_ref,
                     w2_ref, b2_ref,
                     w3_ref, b3_ref,
                     w4_ref, b4_ref,
                     out_ref, *, act_dtype):
    # bf16 matmul operands (MXU-native), f32 accumulate + f32 bias add,
    # elementwise in act_dtype (bf16 on v6e/v7x, f32 on v5e).
    x = x_ref[...].astype(jnp.bfloat16)

    # fc1 + leaky_relu(0.2)
    h = jnp.dot(x, w1_ref[...], preferred_element_type=jnp.float32) + b1_ref[...]
    h = _leaky_relu(h.astype(act_dtype))
    # Dropout(0.3): inference-mode identity (deterministic forward).
    # TODO(synk): training-mode dropout (mask + 1/(1-p) scaling) not implemented.

    # fc2 + leaky_relu(0.2)
    h = jnp.dot(h.astype(jnp.bfloat16), w2_ref[...],
                preferred_element_type=jnp.float32) + b2_ref[...]
    h = _leaky_relu(h.astype(act_dtype))

    # fc3 + leaky_relu(0.2)
    h = jnp.dot(h.astype(jnp.bfloat16), w3_ref[...],
                preferred_element_type=jnp.float32) + b3_ref[...]
    h = _leaky_relu(h.astype(act_dtype))

    # fc4 + tanh (tanh rides the EUP slot; keep it in-kernel)
    o = jnp.dot(h.astype(jnp.bfloat16), w4_ref[...],
                preferred_element_type=jnp.float32) + b4_ref[...]
    out_ref[...] = jnp.tanh(o).astype(out_ref.dtype)


def generator_forward(x, params, *, tile_m=None):
    """x: [B, input_size] float32. params: dict of (w: [in, out], b: [1, out])."""
    B, in_dim = x.shape
    out_dim = params["w4"].shape[1]

    # ---- device-generation dispatch (static, at trace time) ----
    try:
        kind = jax.devices()[0].device_kind.lower()
    except Exception:  # pragma: no cover - defensive
        kind = ""
    is_v5 = "v5" in kind
    is_v7 = "v7" in kind
    act_dtype = jnp.float32 if is_v5 else jnp.bfloat16   # no bf16 VALU on v5e
    mxu_align = 128 if is_v5 else 256                    # MXU-native M multiple

    # ---- pad every layer's N (and the next layer's K) up to a 128 multiple ----
    # Zero padding keeps the math exact: padded activations are leaky_relu(0)=0
    # and padded weight rows are 0, so they contribute nothing downstream.
    def pad_layer(w, b, k_pad):
        n = w.shape[1]
        n_pad = _round_up(n, 128)
        w = jnp.pad(w, ((0, k_pad - w.shape[0]), (0, n_pad - n)))
        b = jnp.pad(b, ((0, 0), (0, n_pad - n)))
        return w, b, n_pad

    w1, b1, d1p = pad_layer(params["w1"], params["b1"], in_dim)
    w2, b2, d2p = pad_layer(params["w2"], params["b2"], d1p)
    w3, b3, d3p = pad_layer(params["w3"], params["b3"], d2p)
    w4, b4, out_dim_p = pad_layer(params["w4"], params["b4"], d3p)

    # bf16 weights (MXU-native, half the DMA bytes); biases stay f32.
    w1 = w1.astype(jnp.bfloat16)
    w2 = w2.astype(jnp.bfloat16)
    w3 = w3.astype(jnp.bfloat16)
    w4 = w4.astype(jnp.bfloat16)

    # ---- batch tiling: few, large grid steps (kernel is overhead/DMA bound) ----
    if tile_m is None:
        target_steps = 2 if is_v7 else 1     # v7x: keep both TensorCores busy
        tile_m = min(pl.cdiv(B, target_steps), 1024)
    tile_m = _round_up(tile_m, mxu_align if tile_m >= mxu_align else 8)
    B_p = _round_up(B, tile_m)
    grid = (B_p // tile_m,)
    x_p = jnp.pad(x, ((0, B_p - B), (0, 0))) if B_p != B else x

    # ---- BlockSpecs ----
    def row_tile(i):        # x / out: advance along the batch axis
        return (i, 0)

    def pinned(i):          # weights / biases: constant block -> stay in VMEM
        return (0, 0)

    def resident_spec(a):   # single VMEM buffer (never re-DMA'd)
        return pl.BlockSpec(a.shape, pinned, pipeline_mode=pl.Buffered(1))

    in_specs = [pl.BlockSpec((tile_m, in_dim), row_tile)]
    for w, b in ((w1, b1), (w2, b2), (w3, b3), (w4, b4)):
        in_specs.append(resident_spec(w))
        in_specs.append(resident_spec(b))
    out_spec = pl.BlockSpec((tile_m, out_dim_p), row_tile)

    # ---- VMEM budget: raise the scoped limit only when actually needed ----
    weight_bytes = sum(int(a.size) * a.dtype.itemsize
                       for a in (w1, w2, w3, w4, b1, b2, b3, b4))
    x_tile_bytes = tile_m * in_dim * x.dtype.itemsize
    out_tile_bytes = tile_m * out_dim_p * 4
    inter_bytes = tile_m * (d1p + d2p + d3p) * 4 * 2       # generous: f32 acc + act
    vmem_needed = int(1.5 * (2 * x_tile_bytes + 2 * out_tile_bytes
                             + weight_bytes + inter_bytes))
    vmem_limit = None
    if vmem_needed > 32 * 1024 * 1024:
        vmem_limit = min(vmem_needed, 64 * 1024 * 1024)    # v7x physical per-TC cap

    flops = 2 * B_p * (in_dim * d1p + d1p * d2p + d2p * d3p + d3p * out_dim_p)
    bytes_accessed = (int(x_p.size) * x_p.dtype.itemsize
                      + B_p * out_dim_p * 4 + weight_bytes)
    cost = pl.CostEstimate(flops=flops,
                           transcendentals=B_p * out_dim_p,
                           bytes_accessed=bytes_accessed)

    kernel = functools.partial(generator_kernel, act_dtype=act_dtype)
    out = pl.pallas_call(
        kernel,
        out_shape=jax.ShapeDtypeStruct((B_p, out_dim_p), jnp.float32),
        grid_spec=pltpu.PrefetchScalarGridSpec(
            num_scalar_prefetch=0,
            grid=grid,
            in_specs=in_specs,
            out_specs=out_spec,
        ),
        compiler_params=pltpu.CompilerParams(
            dimension_semantics=("parallel",),
            vmem_limit_bytes=vmem_limit,
        ),
        cost_estimate=cost,
    )(x_p, w1, b1, w2, b2, w3, b3, w4, b4)

    return out[:B, :out_dim]


def init_linear(key, fan_in, fan_out):
    """PyTorch nn.Linear-style init (uniform +-1/sqrt(fan_in)); W stored as [in, out]."""
    kw, kb = jax.random.split(key)
    bound = 1.0 / jnp.sqrt(jnp.float32(fan_in))
    w = jax.random.uniform(kw, (fan_in, fan_out), jnp.float32, -bound, bound)
    b = jax.random.uniform(kb, (1, fan_out), jnp.float32, -bound, bound)
    return w, b


if __name__ == "__main__":
    # Generator MLP at reduced (but representative) sizes:
    # latent input_size=32, hidden_dim=32 (-> 64 -> 128), output_size=64.
    batch = 256          # exercises the batch-tiled grid / tile auto-sizing
    input_size = 32
    hidden_dim = 32
    output_size = 64

    root = jax.random.PRNGKey(0)
    kx, k1, k2, k3, k4 = jax.random.split(root, 5)

    x = jax.random.normal(kx, (batch, input_size), jnp.float32)

    w1, b1 = init_linear(k1, input_size, hidden_dim)
    w2, b2 = init_linear(k2, hidden_dim, hidden_dim * 2)
    w3, b3 = init_linear(k3, hidden_dim * 2, hidden_dim * 4)
    w4, b4 = init_linear(k4, hidden_dim * 4, output_size)

    params = dict(w1=w1, b1=b1, w2=w2, b2=b2, w3=w3, b3=b3, w4=w4, b4=b4)

    out = jax.jit(generator_forward)(x, params)
    out = jax.block_until_ready(out)

    # Pure-JAX f32 reference (eval-mode dropout = identity). Kernel uses bf16
    # matmul inputs (and bf16 activations on v6e/v7x) with f32 accumulation,
    # so loosen tolerance accordingly.
    def ref(x):
        h = jax.nn.leaky_relu(x @ w1 + b1, 0.2)
        h = jax.nn.leaky_relu(h @ w2 + b2, 0.2)
        h = jax.nn.leaky_relu(h @ w3 + b3, 0.2)
        return jnp.tanh(h @ w4 + b4)

    expected = ref(x)
    assert out.shape == (batch, output_size)
    err = float(jnp.max(jnp.abs(out - expected)))
    assert jnp.allclose(out, expected, atol=4e-2, rtol=4e-2), f"max abs err {err}"

    print("KERNEL_OK")
</pallas_src>

<mosaic_0001>
module attributes {stable_mosaic.version = 11 : i64} {
  func.func @generator_kernel(%arg0: i32, %arg1: memref<256x32xf32, #tpu.memory_space<vmem>>, %arg2: memref<32x128xbf16, #tpu.memory_space<vmem>>, %arg3: memref<1x128xf32, #tpu.memory_space<vmem>>, %arg4: memref<128x128xbf16, #tpu.memory_space<vmem>>, %arg5: memref<1x128xf32, #tpu.memory_space<vmem>>, %arg6: memref<128x128xbf16, #tpu.memory_space<vmem>>, %arg7: memref<1x128xf32, #tpu.memory_space<vmem>>, %arg8: memref<128x128xbf16, #tpu.memory_space<vmem>>, %arg9: memref<1x128xf32, #tpu.memory_space<vmem>>, %arg10: memref<256x128xf32, #tpu.memory_space<vmem>>) attributes {dimension_semantics = [#tpu.dimension_semantics<parallel>], iteration_bounds = array<i64: 1>, scalar_prefetch = 0 : i64, scratch_operands = 0 : i64, tpu.core_type = #tpu.core_type<tc>, window_params = [{transform_indices = @transform_0, window_bounds = array<i64: 256, 32>}, {pipeline_mode = #tpu.pipeline_mode<synchronous>, transform_indices = @transform_1, window_bounds = array<i64: 32, 128>}, {pipeline_mode = #tpu.pipeline_mode<synchronous>, transform_indices = @transform_2, window_bounds = array<i64: 1, 128>}, {pipeline_mode = #tpu.pipeline_mode<synchronous>, transform_indices = @transform_3, window_bounds = array<i64: 128, 128>}, {pipeline_mode = #tpu.pipeline_mode<synchronous>, transform_indices = @transform_4, window_bounds = array<i64: 1, 128>}, {pipeline_mode = #tpu.pipeline_mode<synchronous>, transform_indices = @transform_5, window_bounds = array<i64: 128, 128>}, {pipeline_mode = #tpu.pipeline_mode<synchronous>, transform_indices = @transform_6, window_bounds = array<i64: 1, 128>}, {pipeline_mode = #tpu.pipeline_mode<synchronous>, transform_indices = @transform_7, window_bounds = array<i64: 128, 128>}, {pipeline_mode = #tpu.pipeline_mode<synchronous>, transform_indices = @transform_8, window_bounds = array<i64: 1, 128>}, {transform_indices = @transform_9, window_bounds = array<i64: 256, 128>}]} {
    %c0 = arith.constant 0 : index
    %c0_0 = arith.constant 0 : index
    %0 = vector.load %arg1[%c0, %c0_0] : memref<256x32xf32, #tpu.memory_space<vmem>>, vector<256x32xf32>
    %1 = arith.truncf %0 : vector<256x32xf32> to vector<256x32xbf16>
    %c0_1 = arith.constant 0 : index
    %c0_2 = arith.constant 0 : index
    %2 = vector.load %arg2[%c0_1, %c0_2] : memref<32x128xbf16, #tpu.memory_space<vmem>>, vector<32x128xbf16>
    %cst = arith.constant dense<0.000000e+00> : vector<256x128xf32>
    %3 = tpu.matmul %1, %2, %cst {dimension_numbers = #tpu.dot_dimension_numbers<[1], [0], [0], [1], [0, 0, 1, 1], [], []>} : vector<256x32xbf16>, vector<32x128xbf16>, vector<256x128xf32> -> vector<256x128xf32>
    %c0_3 = arith.constant 0 : index
    %c0_4 = arith.constant 0 : index
    %4 = vector.load %arg3[%c0_3, %c0_4] : memref<1x128xf32, #tpu.memory_space<vmem>>, vector<1x128xf32>
    %5 = vector.broadcast %4 : vector<1x128xf32> to vector<256x128xf32>
    %6 = arith.addf %3, %5 : vector<256x128xf32>
    %7 = arith.truncf %6 : vector<256x128xf32> to vector<256x128xbf16>
    %cst_5 = arith.constant 2.001950e-01 : bf16
    %8 = vector.broadcast %cst_5 : bf16 to vector<256x128xbf16>
    %9 = arith.mulf %7, %8 : vector<256x128xbf16>
    %10 = arith.maximumf %7, %9 : vector<256x128xbf16>
    %c0_6 = arith.constant 0 : index
    %c0_7 = arith.constant 0 : index
    %11 = vector.load %arg4[%c0_6, %c0_7] : memref<128x128xbf16, #tpu.memory_space<vmem>>, vector<128x128xbf16>
    %cst_8 = arith.constant dense<0.000000e+00> : vector<256x128xf32>
    %12 = tpu.matmul %10, %11, %cst_8 {dimension_numbers = #tpu.dot_dimension_numbers<[1], [0], [0], [1], [0, 0, 1, 1], [], []>} : vector<256x128xbf16>, vector<128x128xbf16>, vector<256x128xf32> -> vector<256x128xf32>
    %c0_9 = arith.constant 0 : index
    %c0_10 = arith.constant 0 : index
    %13 = vector.load %arg5[%c0_9, %c0_10] : memref<1x128xf32, #tpu.memory_space<vmem>>, vector<1x128xf32>
    %14 = vector.broadcast %13 : vector<1x128xf32> to vector<256x128xf32>
    %15 = arith.addf %12, %14 : vector<256x128xf32>
    %16 = arith.truncf %15 : vector<256x128xf32> to vector<256x128xbf16>
    %cst_11 = arith.constant 2.001950e-01 : bf16
    %17 = vector.broadcast %cst_11 : bf16 to vector<256x128xbf16>
    %18 = arith.mulf %16, %17 : vector<256x128xbf16>
    %19 = arith.maximumf %16, %18 : vector<256x128xbf16>
    %c0_12 = arith.constant 0 : index
    %c0_13 = arith.constant 0 : index
    %20 = vector.load %arg6[%c0_12, %c0_13] : memref<128x128xbf16, #tpu.memory_space<vmem>>, vector<128x128xbf16>
    %cst_14 = arith.constant dense<0.000000e+00> : vector<256x128xf32>
    %21 = tpu.matmul %19, %20, %cst_14 {dimension_numbers = #tpu.dot_dimension_numbers<[1], [0], [0], [1], [0, 0, 1, 1], [], []>} : vector<256x128xbf16>, vector<128x128xbf16>, vector<256x128xf32> -> vector<256x128xf32>
    %c0_15 = arith.constant 0 : index
    %c0_16 = arith.constant 0 : index
    %22 = vector.load %arg7[%c0_15, %c0_16] : memref<1x128xf32, #tpu.memory_space<vmem>>, vector<1x128xf32>
    %23 = vector.broadcast %22 : vector<1x128xf32> to vector<256x128xf32>
    %24 = arith.addf %21, %23 : vector<256x128xf32>
    %25 = arith.truncf %24 : vector<256x128xf32> to vector<256x128xbf16>
    %cst_17 = arith.constant 2.001950e-01 : bf16
    %26 = vector.broadcast %cst_17 : bf16 to vector<256x128xbf16>
    %27 = arith.mulf %25, %26 : vector<256x128xbf16>
    %28 = arith.maximumf %25, %27 : vector<256x128xbf16>
    %c0_18 = arith.constant 0 : index
    %c0_19 = arith.constant 0 : index
    %29 = vector.load %arg8[%c0_18, %c0_19] : memref<128x128xbf16, #tpu.memory_space<vmem>>, vector<128x128xbf16>
    %cst_20 = arith.constant dense<0.000000e+00> : vector<256x128xf32>
    %30 = tpu.matmul %28, %29, %cst_20 {dimension_numbers = #tpu.dot_dimension_numbers<[1], [0], [0], [1], [0, 0, 1, 1], [], []>} : vector<256x128xbf16>, vector<128x128xbf16>, vector<256x128xf32> -> vector<256x128xf32>
    %c0_21 = arith.constant 0 : index
    %c0_22 = arith.constant 0 : index
    %31 = vector.load %arg9[%c0_21, %c0_22] : memref<1x128xf32, #tpu.memory_space<vmem>>, vector<1x128xf32>
    %32 = vector.broadcast %31 : vector<1x128xf32> to vector<256x128xf32>
    %33 = arith.addf %30, %32 : vector<256x128xf32>
    %34 = math.tanh %33 : vector<256x128xf32>
    %c0_23 = arith.constant 0 : index
    %c0_24 = arith.constant 0 : index
    %35 = vector.load %arg10[%c0_23, %c0_24] : memref<256x128xf32, #tpu.memory_space<vmem>>, vector<256x128xf32>
    tpu.vector_store %arg10[%c0_23, %c0_24], %34 {strides = array<i32>} : memref<256x128xf32, #tpu.memory_space<vmem>>, vector<256x128xf32>,
    return
  }
  func.func @transform_0(%arg0: i32) -> (i32, i32) {
    %c0_i32 = arith.constant 0 : i32
    %c0_i32_0 = arith.constant 0 : i32
    return %arg0, %c0_i32 : i32, i32
  }
  func.func @transform_1(%arg0: i32) -> (i32, i32) {
    %c0_i32 = arith.constant 0 : i32
    %c0_i32_0 = arith.constant 0 : i32
    %c0_i32_1 = arith.constant 0 : i32
    return %c0_i32, %c0_i32_0 : i32, i32
  }
  func.func @transform_2(%arg0: i32) -> (i32, i32) {
    %c0_i32 = arith.constant 0 : i32
    %c0_i32_0 = arith.constant 0 : i32
    %c0_i32_1 = arith.constant 0 : i32
    return %c0_i32, %c0_i32_0 : i32, i32
  }
  func.func @transform_3(%arg0: i32) -> (i32, i32) {
    %c0_i32 = arith.constant 0 : i32
    %c0_i32_0 = arith.constant 0 : i32
    %c0_i32_1 = arith.constant 0 : i32
    return %c0_i32, %c0_i32_0 : i32, i32
  }
  func.func @transform_4(%arg0: i32) -> (i32, i32) {
    %c0_i32 = arith.constant 0 : i32
    %c0_i32_0 = arith.constant 0 : i32
    %c0_i32_1 = arith.constant 0 : i32
    return %c0_i32, %c0_i32_0 : i32, i32
  }
  func.func @transform_5(%arg0: i32) -> (i32, i32) {
    %c0_i32 = arith.constant 0 : i32
    %c0_i32_0 = arith.constant 0 : i32
    %c0_i32_1 = arith.constant 0 : i32
    return %c0_i32, %c0_i32_0 : i32, i32
  }
  func.func @transform_6(%arg0: i32) -> (i32, i32) {
    %c0_i32 = arith.constant 0 : i32
    %c0_i32_0 = arith.constant 0 : i32
    %c0_i32_1 = arith.constant 0 : i32
    return %c0_i32, %c0_i32_0 : i32, i32
  }
  func.func @transform_7(%arg0: i32) -> (i32, i32) {
    %c0_i32 = arith.constant 0 : i32
    %c0_i32_0 = arith.constant 0 : i32
    %c0_i32_1 = arith.constant 0 : i32
    return %c0_i32, %c0_i32_0 : i32, i32
  }
  func.func @transform_8(%arg0: i32) -> (i32, i32) {
    %c0_i32 = arith.constant 0 : i32
    %c0_i32_0 = arith.constant 0 : i32
    %c0_i32_1 = arith.constant 0 : i32
    return %c0_i32, %c0_i32_0 : i32, i32
  }
  func.func @transform_9(%arg0: i32) -> (i32, i32) {
    %c0_i32 = arith.constant 0 : i32
    %c0_i32_0 = arith.constant 0 : i32
    return %arg0, %c0_i32 : i32, i32
  }
}

</mosaic_0001>

<bundles_post_ra>
// kernel: generator_forward.1
= control target key start
LH: loop header
LB: loop body
LE: loop exit
PB: predicated region body
PF: predicated region fallthrough
CT: control target
= control target key end

     0   :  { %vm101_vm0 = vcmask 261120   ;;  %s2100_s1 = inlined_call_operand.vmem [shape: bf16[32,128], index: 1, kind: input, shape index: {}]   ;;  %s2101_s0 = inlined_call_operand.vmem [shape: f32[256,32], index: 0, kind: input, shape index: {}]   ;;  %s2102_s2 = inlined_call_operand.vmem [shape: f32[1,128], index: 2, kind: input, shape index: {}]   ;;  %s2103_s3 = inlined_call_operand.vmem [shape: bf16[128,128], index: 3, kind: input, shape index: {}]   ;;  %s2104_s4 = inlined_call_operand.vmem [shape: f32[1,128], index: 4, kind: input, shape index: {}]   ;;  %s2105_s5 = inlined_call_operand.vmem [shape: bf16[128,128], index: 5, kind: input, shape index: {}]   ;;  %s2106_s6 = inlined_call_operand.vmem [shape: f32[1,128], index: 6, kind: input, shape index: {}]   ;;  %s2107_s7 = inlined_call_operand.vmem [shape: bf16[128,128], index: 7, kind: input, shape index: {}]   ;;  %s2108_s8 = inlined_call_operand.vmem [shape: f32[1,128], index: 8, kind: input, shape index: {}]   ;;  %s2109_s9 = inlined_call_operand.vmem [shape: f32[256,128], index: 9, kind: output, shape index: {}]  }
   0x1   :  { %v1523_v0 = vld [vmem:[%s2100_s1 + $0x8] sm:$0xff]  ;;  %v1522_v1 = vld [vmem:[%s2100_s1] sm:$0xff]  ;;  %v35_v5 = vld [vmem:[%s2101_s0 + $0x10] sm:$0xff] }
   0x2   :  { %156 = vmatpush.bf16.msra.mxu0 %v1523_v0  ;;  %v33_v2 = vld [vmem:[%s2101_s0] sm:$0xff]  ;;  %v34_v3 = vld [vmem:[%s2101_s0 + $0x8] sm:$0xff]  ;;  %v36_v6 = vld [vmem:[%s2101_s0 + $0x18] sm:$0xff] }
   0x3   :  { %v65_v4 = vpack.c.bf16 %v34_v3, %v33_v2  ;;  %v66_v7 = vpack.c.bf16 %v36_v6, %v35_v5  ;;  %v37_v8 = vld [vmem:[%s2101_s0 + $0x20] sm:$0xff]  ;;  %v38_v9 = vld [vmem:[%s2101_s0 + $0x28] sm:$0xff]  ;;  %v39_v11 = vld [vmem:[%s2101_s0 + $0x30] sm:$0xff] }
   0x4   :  { %v67_v10 = vpack.c.bf16 %v38_v9, %v37_v8  ;;  %v40_v12 = vld [vmem:[%s2101_s0 + $0x38] sm:$0xff]  ;;  %v41_v14 = vld [vmem:[%s2101_s0 + $0x40] sm:$0xff]  ;;  %v42_v15 = vld [vmem:[%s2101_s0 + $0x48] sm:$0xff] }
   0x5   :  { %v68_v13 = vpack.c.bf16 %v40_v12, %v39_v11  ;;  %v69_v16 = vpack.c.bf16 %v42_v15, %v41_v14  ;;  %v43_v17 = vld [vmem:[%s2101_s0 + $0x50] sm:$0xff]  ;;  %v44_v18 = vld [vmem:[%s2101_s0 + $0x58] sm:$0xff]  ;;  %v1529_v22 = vld [vmem:[%s2103_s3 + $0x28] sm:$0xff] }
   0x6   :  { %157 = vmatpush.bf16.msra.mxu0 %v1522_v1  ;;  %v70_v19 = vpack.c.bf16 %v44_v18, %v43_v17  ;;  %v1531_v20 = vld [vmem:[%s2103_s3 + $0x38] sm:$0xff]  ;;  %v1530_v21 = vld [vmem:[%s2103_s3 + $0x30] sm:$0xff]  ;;  %v45_v23 = vld [vmem:[%s2101_s0 + $0x60] sm:$0xff] }
   0x7   :  { %515 = vmatpush.bf16.msra.mxu1 %v1531_v20  ;;  %v46_v24 = vld [vmem:[%s2101_s0 + $0x68] sm:$0xff]  ;;  %v1528_v26 = vld [vmem:[%s2103_s3 + $0x20] sm:$0xff]  ;;  %v1527_v27 = vld [vmem:[%s2103_s3 + $0x18] sm:$0xff] }
   0x8   :  { %v71_v25 = vpack.c.bf16 %v46_v24, %v45_v23  ;;  %v1526_v28 = vld [vmem:[%s2103_s3 + $0x10] sm:$0xff]  ;;  %v48_v30 = vld [vmem:[%s2101_s0 + $0x78] sm:$0xff]  ;;  %v1525_v31 = vld [vmem:[%s2103_s3 + $0x8] sm:$0xff] }
   0x9   :  { %1410 = vmatmul.msk.bf16.vlgmr.msra.gmra.mxu0 %vm101_vm0, %v65_v4  ;;  %v47_v29 = vld [vmem:[%s2101_s0 + $0x70] sm:$0xff]  ;;  %v1524_v33 = vld [vmem:[%s2103_s3] sm:$0xff]  ;;  %v50_v35 = vld [vmem:[%s2101_s0 + $0x88] sm:$0xff] }
   0xa   :  { %v72_v32 = vpack.c.bf16 %v48_v30, %v47_v29  ;;  %v49_v34 = vld [vmem:[%s2101_s0 + $0x80] sm:$0xff]  ;;  %v51_v45 = vld [vmem:[%s2101_s0 + $0x90] sm:$0xff]  ;;  %v52_v46 = vld [vmem:[%s2101_s0 + $0x98] sm:$0xff] }
   0xb   :  { %516 = vmatpush.bf16.msra.mxu1 %v1530_v21  ;;  %v1761_v36 = vld [vmem:[%s2102_s2] ss:$0 sm:$0xff]  ;;  %v73_v37 = vpack.c.bf16 %v50_v35, %v49_v34  ;;  %v74_v50 = vpack.c.bf16 %v52_v46, %v51_v45  ;;  %v54_v62 = vld [vmem:[%s2101_s0 + $0xa8] sm:$0xff]  ;;  %v56_v14 = vld [vmem:[%s2101_s0 + $0xb8] sm:$0xff] }
   0xc   :  { %v53_v61 = vld [vmem:[%s2101_s0 + $0xa0] sm:$0xff]  ;;  %v58_v30 = vld [vmem:[%s2101_s0 + $0xc8] sm:$0xff]  ;;  %v59_v46 = vld [vmem:[%s2101_s0 + $0xd0] sm:$0xff] }
   0xd   :  { %v75_v2 = vpack.c.bf16 %v54_v62, %v53_v61  ;;  %v57_v29 = vld [vmem:[%s2101_s0 + $0xc0] sm:$0xff] }
   0xe   :  { %v77_v34 = vpack.c.bf16 %v58_v30, %v57_v29  ;;  %v61_v62 = vld [vmem:[%s2101_s0 + $0xe0] sm:$0xff]  ;;  %v1535_v30 = vld [vmem:[%s2105_s5 + $0x18] sm:$0xff] }
   0xf   :  { %517 = vmatpush.bf16.msra.mxu1 %v1529_v22 }
  0x13   :  { %518 = vmatpush.bf16.msra.mxu1 %v1528_v26 }
  0x17   :  { %519 = vmatpush.bf16.msra.mxu1 %v1527_v27 }
  0x19   :  { %1411 = vmatmul.msk.bf16.gmra.mxu0 %vm101_vm0, %v66_v7 }
  0x1b   :  { %520 = vmatpush.bf16.msra.mxu1 %v1526_v28 }
  0x1f   :  { %521 = vmatpush.bf16.msra.mxu1 %v1525_v31 }
  0x23   :  { %522 = vmatpush.bf16.msra.mxu1 %v1524_v33 }
  0x29   :  { %1412 = vmatmul.msk.bf16.gmra.mxu0 %vm101_vm0, %v67_v10 }
  0x39   :  { %1413 = vmatmul.msk.bf16.gmra.mxu0 %vm101_vm0, %v68_v13  ;;  %v55_v13 = vld [vmem:[%s2101_s0 + $0xb0] sm:$0xff] }
  0x3a   :  { %v76_v18 = vpack.c.bf16 %v56_v14, %v55_v13  ;;  %v1538_v14 = vld [vmem:[%s2105_s5 + $0x30] sm:$0xff] }
  0x49   :  { %1414 = vmatmul.msk.bf16.gmra.mxu0 %vm101_vm0, %v69_v16 }
  0x59   :  { %1415 = vmatmul.msk.bf16.gmra.mxu0 %vm101_vm0, %v70_v19 }
  0x69   :  { %1416 = vmatmul.msk.bf16.gmra.mxu0 %vm101_vm0, %v71_v25 }
  0x79   :  { %1417 = vmatmul.msk.bf16.gmra.mxu0 %vm101_vm0, %v72_v32 }
  0x86   :  { %v159_v38 = vpop.f32.mrf.mxu0 }
  0x87   :  { %v160_v39 = vadd.f32 %v1761_v36, %v159_v38 }
  0x89   :  { %1418 = vmatmul.msk.bf16.gmra.mxu0 %vm101_vm0, %v73_v37  ;;  %v239_v40 = vpack.c.bf16 %v160_v39, %v160_v39 }
  0x8b   :  { %v271_v42 = vunpack.c.l.bf16 %v239_v40 }
  0x8d   :  { %v303_v47 = vmul.f32 0.20019531, %v271_v42 }
  0x8e   :  { %v161_v41 = vpop.f32.mrf.mxu0 }
  0x8f   :  { %v162_v43 = vadd.f32 %v1761_v36, %v161_v41  ;;  %v399_v53 = vmax.f32 %v271_v42, %v303_v47  ;;  %v60_v47 = vld [vmem:[%s2101_s0 + $0xd8] sm:$0xff] }
  0x91   :  { %v240_v44 = vpack.c.bf16 %v162_v43, %v162_v43 }
  0x93   :  { %v272_v48 = vunpack.c.l.bf16 %v240_v44 }
  0x95   :  { %v304_v49 = vmul.f32 0.20019531, %v272_v48 }
  0x96   :  { %v164_v51 = vpop.f32.mrf.mxu0 }
  0x97   :  { %v165_v52 = vadd.f32 %v1761_v36, %v164_v51  ;;  %v400_v54 = vmax.f32 %v272_v48, %v304_v49  ;;  %v78_v51 = vpack.c.bf16 %v60_v47, %v59_v46 }
  0x99   :  { %1419 = vmatmul.msk.bf16.gmra.mxu0 %vm101_vm0, %v74_v50  ;;  %v431_v55 = vpack.c.bf16 %v400_v54, %v399_v53  ;;  %v241_v56 = vpack.c.bf16 %v165_v52, %v165_v52 }
  0x9b   :  { %523 = vmatmul.bf16.vlgmr.msra.gmra.mxu1 %v431_v55  ;;  %v273_v58 = vunpack.c.l.bf16 %v241_v56 }
  0x9d   :  { %v305_v63 = vmul.f32 0.20019531, %v273_v58 }
  0x9e   :  { %v166_v57 = vpop.f32.mrf.mxu0 }
  0x9f   :  { %v167_v59 = vadd.f32 %v1761_v36, %v166_v57  ;;  %v401_v5 = vmax.f32 %v273_v58, %v305_v63  ;;  %v62_v63 = vld [vmem:[%s2101_s0 + $0xe8] sm:$0xff] }
  0xa1   :  { %v242_v60 = vpack.c.bf16 %v167_v59, %v167_v59 }
  0xa3   :  { %v274_v0 = vunpack.c.l.bf16 %v242_v60 }
  0xa5   :  { %v306_v1 = vmul.f32 0.20019531, %v274_v0 }
  0xa6   :  { %v169_v3 = vpop.f32.mrf.mxu0 }
  0xa7   :  { %v170_v4 = vadd.f32 %v1761_v36, %v169_v3  ;;  %v402_v6 = vmax.f32 %v274_v0, %v306_v1  ;;  %v79_v3 = vpack.c.bf16 %v62_v63, %v61_v62 }
  0xa9   :  { %1420 = vmatmul.msk.bf16.gmra.mxu0 %vm101_vm0, %v75_v2  ;;  %v432_v7 = vpack.c.bf16 %v402_v6, %v401_v5  ;;  %v243_v8 = vpack.c.bf16 %v170_v4, %v170_v4 }
  0xab   :  { %528 = vmatmul.bf16.gmra.mxu1 %v432_v7  ;;  %v275_v10 = vunpack.c.l.bf16 %v243_v8 }
  0xad   :  { %v307_v15 = vmul.f32 0.20019531, %v275_v10 }
  0xae   :  { %v171_v9 = vpop.f32.mrf.mxu0 }
  0xaf   :  { %v172_v11 = vadd.f32 %v1761_v36, %v171_v9  ;;  %v403_v21 = vmax.f32 %v275_v10, %v307_v15  ;;  %v1539_v10 = vld [vmem:[%s2105_s5 + $0x38] sm:$0xff] }
  0xb0   :  { %880 = vmatpush.bf16.msra.mxu2 %v1539_v10 }
  0xb1   :  { %v244_v12 = vpack.c.bf16 %v172_v11, %v172_v11 }
  0xb3   :  { %v276_v16 = vunpack.c.l.bf16 %v244_v12 }
  0xb4   :  { %881 = vmatpush.bf16.msra.mxu2 %v1538_v14 }
  0xb5   :  { %v308_v17 = vmul.f32 0.20019531, %v276_v16 }
  0xb6   :  { %v174_v19 = vpop.f32.mrf.mxu0 }
  0xb7   :  { %v175_v20 = vadd.f32 %v1761_v36, %v174_v19  ;;  %v404_v22 = vmax.f32 %v276_v16, %v308_v17  ;;  %v63_v16 = vld [vmem:[%s2101_s0 + $0xf0] sm:$0xff]  ;;  %v64_v17 = vld [vmem:[%s2101_s0 + $0xf8] sm:$0xff] }
  0xb9   :  { %1421 = vmatmul.msk.bf16.gmra.mxu0 %vm101_vm0, %v76_v18  ;;  %v433_v23 = vpack.c.bf16 %v404_v22, %v403_v21  ;;  %v245_v24 = vpack.c.bf16 %v175_v20, %v175_v20  ;;  %v1537_v20 = vld [vmem:[%s2105_s5 + $0x28] sm:$0xff]  ;;  %v80_v22 = vpack.c.bf16 %v64_v17, %v63_v16 }
  0xba   :  { %882 = vmatpush.bf16.msra.mxu2 %v1537_v20 }
  0xbb   :  { %533 = vmatmul.bf16.gmra.mxu1 %v433_v23  ;;  %v277_v26 = vunpack.c.l.bf16 %v245_v24 }
  0xbd   :  { %v309_v31 = vmul.f32 0.20019531, %v277_v26 }
  0xbe   :  { %v176_v25 = vpop.f32.mrf.mxu0 }
  0xbf   :  { %v177_v27 = vadd.f32 %v1761_v36, %v176_v25  ;;  %v405_v38 = vmax.f32 %v277_v26, %v309_v31 }
  0xc1   :  { %v246_v28 = vpack.c.bf16 %v177_v27, %v177_v27  ;;  %v1536_v27 = vld [vmem:[%s2105_s5 + $0x20] sm:$0xff] }
  0xc2   :  { %883 = vmatpush.bf16.msra.mxu2 %v1536_v27 }
  0xc3   :  { %v278_v32 = vunpack.c.l.bf16 %v246_v28 }
  0xc5   :  { %v310_v33 = vmul.f32 0.20019531, %v278_v32 }
  0xc6   :  { %v179_v35 = vpop.f32.mrf.mxu0  ;;  %884 = vmatpush.bf16.msra.mxu2 %v1535_v30 }
  0xc7   :  { %v180_v37 = vadd.f32 %v1761_v36, %v179_v35  ;;  %v406_v39 = vmax.f32 %v278_v32, %v310_v33 }
  0xc9   :  { %1422 = vmatmul.msk.bf16.gmra.mxu0 %vm101_vm0, %v77_v34  ;;  %v434_v40 = vpack.c.bf16 %v406_v39, %v405_v38  ;;  %v247_v41 = vpack.c.bf16 %v180_v37, %v180_v37  ;;  %v1534_v34 = vld [vmem:[%s2105_s5 + $0x10] sm:$0xff]  ;;  %v1533_v39 = vld [vmem:[%s2105_s5 + $0x8] sm:$0xff] }
  0xca   :  { %885 = vmatpush.bf16.msra.mxu2 %v1534_v34 }
  0xcb   :  { %538 = vmatmul.bf16.gmra.mxu1 %v434_v40  ;;  %v279_v43 = vunpack.c.l.bf16 %v247_v41 }
  0xcd   :  { %v311_v48 = vmul.f32 0.20019531, %v279_v43 }
  0xce   :  { %v181_v42 = vpop.f32.mrf.mxu0  ;;  %886 = vmatpush.bf16.msra.mxu2 %v1533_v39 }
  0xcf   :  { %v182_v44 = vadd.f32 %v1761_v36, %v181_v42  ;;  %v407_v54 = vmax.f32 %v279_v43, %v311_v48 }
  0xd1   :  { %v248_v45 = vpack.c.bf16 %v182_v44, %v182_v44 }
  0xd3   :  { %v280_v49 = vunpack.c.l.bf16 %v248_v45  ;;  %v1532_v45 = vld [vmem:[%s2105_s5] sm:$0xff] }
  0xd4   :  { %887 = vmatpush.bf16.msra.mxu2 %v1532_v45 }
  0xd5   :  { %v312_v50 = vmul.f32 0.20019531, %v280_v49 }
  0xd6   :  { %v184_v52 = vpop.f32.mrf.mxu0 }
  0xd7   :  { %v185_v53 = vadd.f32 %v1761_v36, %v184_v52  ;;  %v408_v55 = vmax.f32 %v280_v49, %v312_v50 }
  0xd9   :  { %1423 = vmatmul.msk.bf16.gmra.mxu0 %vm101_vm0, %v78_v51  ;;  %v435_v56 = vpack.c.bf16 %v408_v55, %v407_v54  ;;  %v249_v57 = vpack.c.bf16 %v185_v53, %v185_v53  ;;  %v1858_v55 = vld [vmem:[%s2104_s4] ss:$0 sm:$0xff] }
  0xdb   :  { %543 = vmatmul.bf16.gmra.mxu1 %v435_v56  ;;  %v281_v59 = vunpack.c.l.bf16 %v249_v57 }
  0xdd   :  { %v313_v0 = vmul.f32 0.20019531, %v281_v59 }
  0xde   :  { %v186_v58 = vpop.f32.mrf.mxu0 }
  0xdf   :  { %v187_v60 = vadd.f32 %v1761_v36, %v186_v58  ;;  %v409_v6 = vmax.f32 %v281_v59, %v313_v0 }
  0xe1   :  { %v250_v61 = vpack.c.bf16 %v187_v60, %v187_v60 }
  0xe3   :  { %v282_v1 = vunpack.c.l.bf16 %v250_v61 }
  0xe5   :  { %v314_v2 = vmul.f32 0.20019531, %v282_v1 }
  0xe6   :  { %v189_v4 = vpop.f32.mrf.mxu0 }
  0xe7   :  { %v190_v5 = vadd.f32 %v1761_v36, %v189_v4  ;;  %v410_v7 = vmax.f32 %v282_v1, %v314_v2 }
  0xe9   :  { %1424 = vmatmul.msk.bf16.gmra.mxu0 %vm101_vm0, %v79_v3  ;;  %v436_v8 = vpack.c.bf16 %v410_v7, %v409_v6  ;;  %v251_v9 = vpack.c.bf16 %v190_v5, %v190_v5 }
  0xeb   :  { %548 = vmatmul.bf16.gmra.mxu1 %v436_v8  ;;  %v283_v12 = vunpack.c.l.bf16 %v251_v9 }
  0xed   :  { %v315_v18 = vmul.f32 0.20019531, %v283_v12 }
  0xee   :  { %v191_v11 = vpop.f32.mrf.mxu0 }
  0xef   :  { %v192_v13 = vadd.f32 %v1761_v36, %v191_v11  ;;  %v411_v25 = vmax.f32 %v283_v12, %v315_v18 }
  0xf1   :  { %v252_v15 = vpack.c.bf16 %v192_v13, %v192_v13 }
  0xf3   :  { %v284_v19 = vunpack.c.l.bf16 %v252_v15 }
  0xf5   :  { %v316_v21 = vmul.f32 0.20019531, %v284_v19 }
  0xf6   :  { %v194_v23 = vpop.f32.mrf.mxu0 }
  0xf7   :  { %v195_v24 = vadd.f32 %v1761_v36, %v194_v23  ;;  %v412_v26 = vmax.f32 %v284_v19, %v316_v21 }
  0xf9   :  { %1425 = vmatmul.msk.bf16.gmra.mxu0 %vm101_vm0, %v80_v22  ;;  %v437_v28 = vpack.c.bf16 %v412_v26, %v411_v25  ;;  %v253_v29 = vpack.c.bf16 %v195_v24, %v195_v24 }
  0xfb   :  { %553 = vmatmul.bf16.gmra.mxu1 %v437_v28  ;;  %v285_v32 = vunpack.c.l.bf16 %v253_v29 }
  0xfd   :  { %v317_v37 = vmul.f32 0.20019531, %v285_v32 }
  0xfe   :  { %v196_v31 = vpop.f32.mrf.mxu0 }
  0xff   :  { %v197_v33 = vadd.f32 %v1761_v36, %v196_v31  ;;  %v413_v43 = vmax.f32 %v285_v32, %v317_v37 }
 0x101   :  { %v254_v35 = vpack.c.bf16 %v197_v33, %v197_v33 }
 0x103   :  { %v286_v38 = vunpack.c.l.bf16 %v254_v35 }
 0x105   :  { %v318_v40 = vmul.f32 0.20019531, %v286_v38 }
 0x106   :  { %v199_v41 = vpop.f32.mrf.mxu0 }
 0x107   :  { %v200_v42 = vadd.f32 %v1761_v36, %v199_v41  ;;  %v414_v44 = vmax.f32 %v286_v38, %v318_v40 }
 0x109   :  { %v438_v46 = vpack.c.bf16 %v414_v44, %v413_v43  ;;  %v255_v47 = vpack.c.bf16 %v200_v42, %v200_v42 }
 0x10b   :  { %558 = vmatmul.bf16.gmra.mxu1 %v438_v46  ;;  %v287_v49 = vunpack.c.l.bf16 %v255_v47 }
 0x10d   :  { %v319_v52 = vmul.f32 0.20019531, %v287_v49 }
 0x10e   :  { %v201_v48 = vpop.f32.mrf.mxu0 }
 0x10f   :  { %v202_v50 = vadd.f32 %v1761_v36, %v201_v48  ;;  %v415_v58 = vmax.f32 %v287_v49, %v319_v52 }
 0x111   :  { %v256_v51 = vpack.c.bf16 %v202_v50, %v202_v50 }
 0x113   :  { %v288_v53 = vunpack.c.l.bf16 %v256_v51 }
 0x115   :  { %v320_v54 = vmul.f32 0.20019531, %v288_v53 }
 0x116   :  { %v204_v56 = vpop.f32.mrf.mxu0 }
 0x117   :  { %v205_v57 = vadd.f32 %v1761_v36, %v204_v56  ;;  %v416_v59 = vmax.f32 %v288_v53, %v320_v54 }
 0x118   :  { %v524_v60 = vpop.f32.mrf.mxu1 }
 0x119   :  { %v525_v61 = vadd.f32 %v1858_v55, %v524_v60  ;;  %v439_v62 = vpack.c.bf16 %v416_v59, %v415_v58  ;;  %v257_v63 = vpack.c.bf16 %v205_v57, %v205_v57 }
 0x11b   :  { %563 = vmatmul.bf16.gmra.mxu1 %v439_v62  ;;  %v604_v0 = vpack.c.bf16 %v525_v61, %v525_v61  ;;  %v289_v2 = vunpack.c.l.bf16 %v257_v63 }
 0x11d   :  { %v636_v5 = vunpack.c.l.bf16 %v604_v0  ;;  %v321_v8 = vmul.f32 0.20019531, %v289_v2 }
 0x11e   :  { %v206_v1 = vpop.f32.mrf.mxu0 }
 0x11f   :  { %v207_v3 = vadd.f32 %v1761_v36, %v206_v1  ;;  %v668_v11 = vmul.f32 0.20019531, %v636_v5  ;;  %v417_v17 = vmax.f32 %v289_v2, %v321_v8 }
 0x120   :  { %v526_v4 = vpop.f32.mrf.mxu1 }
 0x121   :  { %v258_v6 = vpack.c.bf16 %v207_v3, %v207_v3  ;;  %v527_v7 = vadd.f32 %v1858_v55, %v526_v4  ;;  %v764_v22 = vmax.f32 %v636_v5, %v668_v11 }
 0x123   :  { %v290_v9 = vunpack.c.l.bf16 %v258_v6  ;;  %v605_v10 = vpack.c.bf16 %v527_v7, %v527_v7 }
 0x125   :  { %v322_v12 = vmul.f32 0.20019531, %v290_v9  ;;  %v637_v13 = vunpack.c.l.bf16 %v605_v10 }
 0x126   :  { %v209_v14 = vpop.f32.mrf.mxu0 }
 0x127   :  { %v669_v15 = vmul.f32 0.20019531, %v637_v13  ;;  %v210_v16 = vadd.f32 %v1761_v36, %v209_v14  ;;  %v418_v18 = vmax.f32 %v290_v9, %v322_v12 }
 0x128   :  { %v529_v19 = vpop.f32.mrf.mxu1 }
 0x129   :  { %v530_v20 = vadd.f32 %v1858_v55, %v529_v19  ;;  %v440_v21 = vpack.c.bf16 %v418_v18, %v417_v17  ;;  %v765_v23 = vmax.f32 %v637_v13, %v669_v15  ;;  %v259_v24 = vpack.c.bf16 %v210_v16, %v210_v16 }
 0x12b   :  { %568 = vmatmul.bf16.gmra.mxu1 %v440_v21  ;;  %v796_v25 = vpack.c.bf16 %v765_v23, %v764_v22  ;;  %v606_v26 = vpack.c.bf16 %v530_v20, %v530_v20  ;;  %v291_v28 = vunpack.c.l.bf16 %v259_v24 }
 0x12d   :  { %888 = vmatmul.bf16.vlgmr.msra.gmra.mxu2 %v796_v25  ;;  %v638_v31 = vunpack.c.l.bf16 %v606_v26  ;;  %v323_v34 = vmul.f32 0.20019531, %v291_v28 }
 0x12e   :  { %v211_v27 = vpop.f32.mrf.mxu0 }
 0x12f   :  { %v212_v29 = vadd.f32 %v1761_v36, %v211_v27  ;;  %v670_v38 = vmul.f32 0.20019531, %v638_v31  ;;  %v419_v44 = vmax.f32 %v291_v28, %v323_v34 }
 0x130   :  { %v531_v30 = vpop.f32.mrf.mxu1 }
 0x131   :  { %v260_v32 = vpack.c.bf16 %v212_v29, %v212_v29  ;;  %v532_v33 = vadd.f32 %v1858_v55, %v531_v30  ;;  %v766_v49 = vmax.f32 %v638_v31, %v670_v38 }
 0x133   :  { %v292_v35 = vunpack.c.l.bf16 %v260_v32  ;;  %v607_v37 = vpack.c.bf16 %v532_v33, %v532_v33 }
 0x135   :  { %v324_v39 = vmul.f32 0.20019531, %v292_v35  ;;  %v639_v40 = vunpack.c.l.bf16 %v607_v37 }
 0x136   :  { %v214_v41 = vpop.f32.mrf.mxu0 }
 0x137   :  { %v671_v42 = vmul.f32 0.20019531, %v639_v40  ;;  %v215_v43 = vadd.f32 %v1761_v36, %v214_v41  ;;  %v420_v45 = vmax.f32 %v292_v35, %v324_v39 }
 0x138   :  { %v534_v46 = vpop.f32.mrf.mxu1 }
 0x139   :  { %v535_v47 = vadd.f32 %v1858_v55, %v534_v46  ;;  %v441_v48 = vpack.c.bf16 %v420_v45, %v419_v44  ;;  %v767_v50 = vmax.f32 %v639_v40, %v671_v42  ;;  %v261_v51 = vpack.c.bf16 %v215_v43, %v215_v43 }
 0x13b   :  { %573 = vmatmul.bf16.gmra.mxu1 %v441_v48  ;;  %v797_v52 = vpack.c.bf16 %v767_v50, %v766_v49  ;;  %v608_v53 = vpack.c.bf16 %v535_v47, %v535_v47  ;;  %v293_v56 = vunpack.c.l.bf16 %v261_v51 }
 0x13d   :  { %893 = vmatmul.bf16.gmra.mxu2 %v797_v52  ;;  %v640_v59 = vunpack.c.l.bf16 %v608_v53  ;;  %v325_v62 = vmul.f32 0.20019531, %v293_v56 }
 0x13e   :  { %v216_v54 = vpop.f32.mrf.mxu0 }
 0x13f   :  { %v217_v57 = vadd.f32 %v1761_v36, %v216_v54  ;;  %v672_v1 = vmul.f32 0.20019531, %v640_v59  ;;  %v421_v7 = vmax.f32 %v293_v56, %v325_v62 }
 0x140   :  { %v536_v58 = vpop.f32.mrf.mxu1 }
 0x141   :  { %v262_v60 = vpack.c.bf16 %v217_v57, %v217_v57  ;;  %v537_v61 = vadd.f32 %v1858_v55, %v536_v58  ;;  %v768_v12 = vmax.f32 %v640_v59, %v672_v1 }
 0x143   :  { %v294_v63 = vunpack.c.l.bf16 %v262_v60  ;;  %v609_v0 = vpack.c.bf16 %v537_v61, %v537_v61 }
 0x145   :  { %v326_v2 = vmul.f32 0.20019531, %v294_v63  ;;  %v641_v3 = vunpack.c.l.bf16 %v609_v0 }
 0x146   :  { %v219_v4 = vpop.f32.mrf.mxu0 }
 0x147   :  { %v673_v5 = vmul.f32 0.20019531, %v641_v3  ;;  %v220_v6 = vadd.f32 %v1761_v36, %v219_v4  ;;  %v422_v8 = vmax.f32 %v294_v63, %v326_v2 }
 0x148   :  { %v539_v9 = vpop.f32.mrf.mxu1 }
 0x149   :  { %v540_v10 = vadd.f32 %v1858_v55, %v539_v9  ;;  %v442_v11 = vpack.c.bf16 %v422_v8, %v421_v7  ;;  %v769_v13 = vmax.f32 %v641_v3, %v673_v5  ;;  %v263_v14 = vpack.c.bf16 %v220_v6, %v220_v6 }
 0x14b   :  { %578 = vmatmul.bf16.gmra.mxu1 %v442_v11  ;;  %v798_v15 = vpack.c.bf16 %v769_v13, %v768_v12  ;;  %v610_v16 = vpack.c.bf16 %v540_v10, %v540_v10  ;;  %v295_v18 = vunpack.c.l.bf16 %v263_v14 }
 0x14d   :  { %898 = vmatmul.bf16.gmra.mxu2 %v798_v15  ;;  %v642_v21 = vunpack.c.l.bf16 %v610_v16  ;;  %v327_v24 = vmul.f32 0.20019531, %v295_v18 }
 0x14e   :  { %v221_v17 = vpop.f32.mrf.mxu0 }
 0x14f   :  { %v222_v19 = vadd.f32 %v1761_v36, %v221_v17  ;;  %v674_v27 = vmul.f32 0.20019531, %v642_v21  ;;  %v423_v31 = vmax.f32 %v295_v18, %v327_v24 }
 0x150   :  { %v541_v20 = vpop.f32.mrf.mxu1 }
 0x151   :  { %v264_v22 = vpack.c.bf16 %v222_v19, %v222_v19  ;;  %v542_v23 = vadd.f32 %v1858_v55, %v541_v20  ;;  %v770_v39 = vmax.f32 %v642_v21, %v674_v27 }
 0x153   :  { %v296_v25 = vunpack.c.l.bf16 %v264_v22  ;;  %v611_v26 = vpack.c.bf16 %v542_v23, %v542_v23 }
 0x155   :  { %v328_v28 = vmul.f32 0.20019531, %v296_v25  ;;  %v643_v29 = vunpack.c.l.bf16 %v611_v26 }
 0x156   :  { %v224_v30 = vpop.f32.mrf.mxu0 }
 0x157   :  { %v424_v32 = vmax.f32 %v296_v25, %v328_v28  ;;  %v675_v33 = vmul.f32 0.20019531, %v643_v29  ;;  %v225_v34 = vadd.f32 %v1761_v36, %v224_v30 }
 0x158   :  { %v544_v35 = vpop.f32.mrf.mxu1 }
 0x159   :  { %v545_v37 = vadd.f32 %v1858_v55, %v544_v35  ;;  %v443_v38 = vpack.c.bf16 %v424_v32, %v423_v31  ;;  %v771_v40 = vmax.f32 %v643_v29, %v675_v33  ;;  %v265_v41 = vpack.c.bf16 %v225_v34, %v225_v34 }
 0x15b   :  { %583 = vmatmul.bf16.gmra.mxu1 %v443_v38  ;;  %v799_v42 = vpack.c.bf16 %v771_v40, %v770_v39  ;;  %v612_v43 = vpack.c.bf16 %v545_v37, %v545_v37  ;;  %v297_v45 = vunpack.c.l.bf16 %v265_v41 }
 0x15d   :  { %903 = vmatmul.bf16.gmra.mxu2 %v799_v42  ;;  %v644_v48 = vunpack.c.l.bf16 %v612_v43  ;;  %v329_v51 = vmul.f32 0.20019531, %v297_v45 }
 0x15e   :  { %v226_v44 = vpop.f32.mrf.mxu0 }
 0x15f   :  { %v227_v46 = vadd.f32 %v1761_v36, %v226_v44  ;;  %v676_v54 = vmul.f32 0.20019531, %v644_v48  ;;  %v425_v59 = vmax.f32 %v297_v45, %v329_v51  ;;  %v1547_v44 = vld [vmem:[%s2107_s7 + $0x38] sm:$0xff]  ;;  %v1546_v51 = vld [vmem:[%s2107_s7 + $0x30] sm:$0xff] }
 0x160   :  { %v546_v47 = vpop.f32.mrf.mxu1  ;;  %1245 = vmatpush.bf16.msra.mxu3 %v1547_v44 }
 0x161   :  { %v266_v49 = vpack.c.bf16 %v227_v46, %v227_v46  ;;  %v547_v50 = vadd.f32 %v1858_v55, %v546_v47  ;;  %v772_v2 = vmax.f32 %v644_v48, %v676_v54 }
 0x163   :  { %v298_v52 = vunpack.c.l.bf16 %v266_v49  ;;  %v613_v53 = vpack.c.bf16 %v547_v50, %v547_v50 }
 0x164   :  { %1246 = vmatpush.bf16.msra.mxu3 %v1546_v51 }
 0x165   :  { %v330_v56 = vmul.f32 0.20019531, %v298_v52  ;;  %v645_v57 = vunpack.c.l.bf16 %v613_v53 }
 0x166   :  { %v229_v58 = vpop.f32.mrf.mxu0 }
 0x167   :  { %v426_v60 = vmax.f32 %v298_v52, %v330_v56  ;;  %v677_v61 = vmul.f32 0.20019531, %v645_v57  ;;  %v230_v62 = vadd.f32 %v1761_v36, %v229_v58  ;;  %v1545_v58 = vld [vmem:[%s2107_s7 + $0x28] sm:$0xff] }
 0x168   :  { %v549_v63 = vpop.f32.mrf.mxu1  ;;  %1247 = vmatpush.bf16.msra.mxu3 %v1545_v58 }
 0x169   :  { %v550_v0 = vadd.f32 %v1858_v55, %v549_v63  ;;  %v444_v1 = vpack.c.bf16 %v426_v60, %v425_v59  ;;  %v773_v3 = vmax.f32 %v645_v57, %v677_v61  ;;  %v267_v4 = vpack.c.bf16 %v230_v62, %v230_v62  ;;  %v1544_v61 = vld [vmem:[%s2107_s7 + $0x20] sm:$0xff] }
 0x16b   :  { %588 = vmatmul.bf16.gmra.mxu1 %v444_v1  ;;  %v800_v5 = vpack.c.bf16 %v773_v3, %v772_v2  ;;  %v614_v6 = vpack.c.bf16 %v550_v0, %v550_v0  ;;  %v299_v8 = vunpack.c.l.bf16 %v267_v4  ;;  %v1543_v1 = vld [vmem:[%s2107_s7 + $0x18] sm:$0xff] }
 0x16c   :  { %1248 = vmatpush.bf16.msra.mxu3 %v1544_v61 }
 0x16d   :  { %908 = vmatmul.bf16.gmra.mxu2 %v800_v5  ;;  %v646_v11 = vunpack.c.l.bf16 %v614_v6  ;;  %v331_v14 = vmul.f32 0.20019531, %v299_v8  ;;  %v1542_v6 = vld [vmem:[%s2107_s7 + $0x10] sm:$0xff] }
 0x16e   :  { %v231_v7 = vpop.f32.mrf.mxu0 }
 0x16f   :  { %v232_v9 = vadd.f32 %v1761_v36, %v231_v7  ;;  %v678_v17 = vmul.f32 0.20019531, %v646_v11  ;;  %v427_v21 = vmax.f32 %v299_v8, %v331_v14  ;;  %v1540_v14 = vld [vmem:[%s2107_s7] sm:$0xff] }
 0x170   :  { %v551_v10 = vpop.f32.mrf.mxu1  ;;  %1249 = vmatpush.bf16.msra.mxu3 %v1543_v1 }
 0x171   :  { %v268_v12 = vpack.c.bf16 %v232_v9, %v232_v9  ;;  %v552_v13 = vadd.f32 %v1858_v55, %v551_v10  ;;  %v774_v28 = vmax.f32 %v646_v11, %v678_v17  ;;  %v1541_v11 = vld [vmem:[%s2107_s7 + $0x8] sm:$0xff] }
 0x173   :  { %v300_v15 = vunpack.c.l.bf16 %v268_v12  ;;  %v615_v16 = vpack.c.bf16 %v552_v13, %v552_v13 }
 0x174   :  { %1250 = vmatpush.bf16.msra.mxu3 %v1542_v6 }
 0x175   :  { %v332_v18 = vmul.f32 0.20019531, %v300_v15  ;;  %v647_v19 = vunpack.c.l.bf16 %v615_v16 }
 0x176   :  { %v234_v20 = vpop.f32.mrf.mxu0 }
 0x177   :  { %v428_v22 = vmax.f32 %v300_v15, %v332_v18  ;;  %v679_v23 = vmul.f32 0.20019531, %v647_v19  ;;  %v235_v24 = vadd.f32 %v1761_v36, %v234_v20 }
 0x178   :  { %v554_v25 = vpop.f32.mrf.mxu1  ;;  %1251 = vmatpush.bf16.msra.mxu3 %v1541_v11 }
 0x179   :  { %v555_v26 = vadd.f32 %v1858_v55, %v554_v25  ;;  %v445_v27 = vpack.c.bf16 %v428_v22, %v427_v21  ;;  %v775_v29 = vmax.f32 %v647_v19, %v679_v23  ;;  %v269_v30 = vpack.c.bf16 %v235_v24, %v235_v24 }
 0x17b   :  { %593 = vmatmul.bf16.gmra.mxu1 %v445_v27  ;;  %v801_v31 = vpack.c.bf16 %v775_v29, %v774_v28  ;;  %v616_v32 = vpack.c.bf16 %v555_v26, %v555_v26  ;;  %v301_v34 = vunpack.c.l.bf16 %v269_v30  ;;  %v1920_v27 = vld [vmem:[%s2106_s6] ss:$0 sm:$0xff] }
 0x17c   :  { %1252 = vmatpush.bf16.msra.mxu3 %v1540_v14 }
 0x17d   :  { %913 = vmatmul.bf16.gmra.mxu2 %v801_v31  ;;  %v648_v38 = vunpack.c.l.bf16 %v616_v32  ;;  %v333_v41 = vmul.f32 0.20019531, %v301_v34 }
 0x17e   :  { %v236_v33 = vpop.f32.mrf.mxu0 }
 0x17f   :  { %v237_v35 = vadd.f32 %v1761_v36, %v236_v33  ;;  %v680_v45 = vmul.f32 0.20019531, %v648_v38  ;;  %v429_v48 = vmax.f32 %v301_v34, %v333_v41 }
 0x180   :  { %v556_v37 = vpop.f32.mrf.mxu1 }
 0x181   :  { %v270_v39 = vpack.c.bf16 %v237_v35, %v237_v35  ;;  %v557_v40 = vadd.f32 %v1858_v55, %v556_v37  ;;  %v776_v54 = vmax.f32 %v648_v38, %v680_v45 }
 0x183   :  { %v302_v42 = vunpack.c.l.bf16 %v270_v39  ;;  %v617_v43 = vpack.c.bf16 %v557_v40, %v557_v40 }
 0x185   :  { %v334_v46 = vmul.f32 0.20019531, %v302_v42  ;;  %v649_v47 = vunpack.c.l.bf16 %v617_v43 }
 0x187   :  { %v430_v49 = vmax.f32 %v302_v42, %v334_v46  ;;  %v681_v50 = vmul.f32 0.20019531, %v649_v47 }
 0x188   :  { %v559_v36 = vpop.f32.mrf.mxu1 }
 0x189   :  { %v560_v52 = vadd.f32 %v1858_v55, %v559_v36  ;;  %v446_v53 = vpack.c.bf16 %v430_v49, %v429_v48  ;;  %v777_v56 = vmax.f32 %v649_v47, %v681_v50 }
 0x18b   :  { %598 = vmatmul.bf16.gmra.mxu1 %v446_v53  ;;  %v802_v57 = vpack.c.bf16 %v777_v56, %v776_v54  ;;  %v618_v59 = vpack.c.bf16 %v560_v52, %v560_v52 }
 0x18d   :  { %918 = vmatmul.bf16.gmra.mxu2 %v802_v57  ;;  %v650_v62 = vunpack.c.l.bf16 %v618_v59 }
 0x18f   :  { %v682_v2 = vmul.f32 0.20019531, %v650_v62 }
 0x190   :  { %v561_v60 = vpop.f32.mrf.mxu1 }
 0x191   :  { %v562_v63 = vadd.f32 %v1858_v55, %v561_v60  ;;  %v778_v8 = vmax.f32 %v650_v62, %v682_v2 }
 0x193   :  { %v619_v0 = vpack.c.bf16 %v562_v63, %v562_v63 }
 0x195   :  { %v651_v3 = vunpack.c.l.bf16 %v619_v0 }
 0x197   :  { %v683_v4 = vmul.f32 0.20019531, %v651_v3 }
 0x198   :  { %v564_v5 = vpop.f32.mrf.mxu1 }
 0x199   :  { %v565_v7 = vadd.f32 %v1858_v55, %v564_v5  ;;  %v779_v9 = vmax.f32 %v651_v3, %v683_v4 }
 0x19b   :  { %v803_v10 = vpack.c.bf16 %v779_v9, %v778_v8  ;;  %v620_v12 = vpack.c.bf16 %v565_v7, %v565_v7 }
 0x19d   :  { %923 = vmatmul.bf16.gmra.mxu2 %v803_v10  ;;  %v652_v15 = vunpack.c.l.bf16 %v620_v12 }
 0x19f   :  { %v684_v18 = vmul.f32 0.20019531, %v652_v15 }
 0x1a0   :  { %v566_v13 = vpop.f32.mrf.mxu1 }
 0x1a1   :  { %v567_v16 = vadd.f32 %v1858_v55, %v566_v13  ;;  %v780_v23 = vmax.f32 %v652_v15, %v684_v18 }
 0x1a3   :  { %v621_v17 = vpack.c.bf16 %v567_v16, %v567_v16 }
 0x1a5   :  { %v653_v19 = vunpack.c.l.bf16 %v621_v17 }
 0x1a7   :  { %v685_v20 = vmul.f32 0.20019531, %v653_v19 }
 0x1a8   :  { %v569_v21 = vpop.f32.mrf.mxu1 }
 0x1a9   :  { %v570_v22 = vadd.f32 %v1858_v55, %v569_v21  ;;  %v781_v24 = vmax.f32 %v653_v19, %v685_v20 }
 0x1ab   :  { %v804_v25 = vpack.c.bf16 %v781_v24, %v780_v23  ;;  %v622_v26 = vpack.c.bf16 %v570_v22, %v570_v22 }
 0x1ad   :  { %928 = vmatmul.bf16.gmra.mxu2 %v804_v25  ;;  %v654_v30 = vunpack.c.l.bf16 %v622_v26 }
 0x1af   :  { %v686_v35 = vmul.f32 0.20019531, %v654_v30 }
 0x1b0   :  { %v571_v28 = vpop.f32.mrf.mxu1  ;;  %v889_v29 = vpop.f32.mrf.mxu2 }
 0x1b1   :  { %v572_v31 = vadd.f32 %v1858_v55, %v571_v28  ;;  %v890_v32 = vadd.f32 %v1920_v27, %v889_v29  ;;  %v782_v44 = vmax.f32 %v654_v30, %v686_v35 }
 0x1b3   :  { %v623_v33 = vpack.c.bf16 %v572_v31, %v572_v31  ;;  %v969_v34 = vpack.c.bf16 %v890_v32, %v890_v32 }
 0x1b5   :  { %v655_v37 = vunpack.c.l.bf16 %v623_v33  ;;  %v1001_v39 = vunpack.c.l.bf16 %v969_v34 }
 0x1b7   :  { %v687_v38 = vmul.f32 0.20019531, %v655_v37  ;;  %v1033_v48 = vmul.f32 0.20019531, %v1001_v39 }
 0x1b8   :  { %v574_v40 = vpop.f32.mrf.mxu1  ;;  %v891_v41 = vpop.f32.mrf.mxu2 }
 0x1b9   :  { %v575_v42 = vadd.f32 %v1858_v55, %v574_v40  ;;  %v892_v43 = vadd.f32 %v1920_v27, %v891_v41  ;;  %v783_v45 = vmax.f32 %v655_v37, %v687_v38  ;;  %v1129_v53 = vmax.f32 %v1001_v39, %v1033_v48 }
 0x1bb   :  { %v970_v46 = vpack.c.bf16 %v892_v43, %v892_v43  ;;  %v805_v47 = vpack.c.bf16 %v783_v45, %v782_v44  ;;  %v624_v49 = vpack.c.bf16 %v575_v42, %v575_v42 }
 0x1bd   :  { %v1002_v50 = vunpack.c.l.bf16 %v970_v46  ;;  %933 = vmatmul.bf16.gmra.mxu2 %v805_v47  ;;  %v656_v54 = vunpack.c.l.bf16 %v624_v49 }
 0x1bf   :  { %v1034_v36 = vmul.f32 0.20019531, %v1002_v50  ;;  %v688_v62 = vmul.f32 0.20019531, %v656_v54 }
 0x1c0   :  { %v576_v51 = vpop.f32.mrf.mxu1  ;;  %v894_v52 = vpop.f32.mrf.mxu2 }
 0x1c1   :  { %v577_v56 = vadd.f32 %v1858_v55, %v576_v51  ;;  %v895_v57 = vadd.f32 %v1920_v27, %v894_v52  ;;  %v1130_v58 = vmax.f32 %v1002_v50, %v1034_v36  ;;  %v784_v6 = vmax.f32 %v656_v54, %v688_v62 }
 0x1c3   :  { %v625_v59 = vpack.c.bf16 %v577_v56, %v577_v56  ;;  %v1161_v60 = vpack.c.bf16 %v1130_v58, %v1129_v53  ;;  %v971_v61 = vpack.c.bf16 %v895_v57, %v895_v57 }
 0x1c5   :  { %v657_v63 = vunpack.c.l.bf16 %v625_v59  ;;  %1253 = vmatmul.bf16.vlgmr.msra.gmra.mxu3 %v1161_v60  ;;  %v1003_v1 = vunpack.c.l.bf16 %v971_v61 }
 0x1c7   :  { %v689_v0 = vmul.f32 0.20019531, %v657_v63  ;;  %v1035_v10 = vmul.f32 0.20019531, %v1003_v1 }
 0x1c8   :  { %v579_v2 = vpop.f32.mrf.mxu1  ;;  %v896_v3 = vpop.f32.mrf.mxu2 }
 0x1c9   :  { %v580_v4 = vadd.f32 %v1858_v55, %v579_v2  ;;  %v897_v5 = vadd.f32 %v1920_v27, %v896_v3  ;;  %v785_v7 = vmax.f32 %v657_v63, %v689_v0  ;;  %v1131_v16 = vmax.f32 %v1003_v1, %v1035_v10 }
 0x1cb   :  { %v972_v8 = vpack.c.bf16 %v897_v5, %v897_v5  ;;  %v806_v9 = vpack.c.bf16 %v785_v7, %v784_v6  ;;  %v626_v11 = vpack.c.bf16 %v580_v4, %v580_v4 }
 0x1cd   :  { %v1004_v12 = vunpack.c.l.bf16 %v972_v8  ;;  %938 = vmatmul.bf16.gmra.mxu2 %v806_v9  ;;  %v658_v17 = vunpack.c.l.bf16 %v626_v11 }
 0x1cf   :  { %v1036_v13 = vmul.f32 0.20019531, %v1004_v12  ;;  %v690_v24 = vmul.f32 0.20019531, %v658_v17 }
 0x1d0   :  { %v581_v14 = vpop.f32.mrf.mxu1  ;;  %v899_v15 = vpop.f32.mrf.mxu2 }
 0x1d1   :  { %v582_v18 = vadd.f32 %v1858_v55, %v581_v14  ;;  %v900_v19 = vadd.f32 %v1920_v27, %v899_v15  ;;  %v1132_v20 = vmax.f32 %v1004_v12, %v1036_v13  ;;  %v786_v33 = vmax.f32 %v658_v17, %v690_v24 }
 0x1d3   :  { %v627_v21 = vpack.c.bf16 %v582_v18, %v582_v18  ;;  %v1162_v22 = vpack.c.bf16 %v1132_v20, %v1131_v16  ;;  %v973_v23 = vpack.c.bf16 %v900_v19, %v900_v19 }
 0x1d5   :  { %v659_v25 = vunpack.c.l.bf16 %v627_v21  ;;  %1258 = vmatmul.bf16.gmra.mxu3 %v1162_v22  ;;  %v1005_v28 = vunpack.c.l.bf16 %v973_v23 }
 0x1d7   :  { %v691_v26 = vmul.f32 0.20019531, %v659_v25  ;;  %v1037_v38 = vmul.f32 0.20019531, %v1005_v28 }
 0x1d8   :  { %v584_v29 = vpop.f32.mrf.mxu1  ;;  %v901_v30 = vpop.f32.mrf.mxu2 }
 0x1d9   :  { %v585_v31 = vadd.f32 %v1858_v55, %v584_v29  ;;  %v902_v32 = vadd.f32 %v1920_v27, %v901_v30  ;;  %v787_v34 = vmax.f32 %v659_v25, %v691_v26  ;;  %v1133_v44 = vmax.f32 %v1005_v28, %v1037_v38 }
 0x1db   :  { %v974_v35 = vpack.c.bf16 %v902_v32, %v902_v32  ;;  %v807_v37 = vpack.c.bf16 %v787_v34, %v786_v33  ;;  %v628_v39 = vpack.c.bf16 %v585_v31, %v585_v31 }
 0x1dd   :  { %v1006_v40 = vunpack.c.l.bf16 %v974_v35  ;;  %943 = vmatmul.bf16.gmra.mxu2 %v807_v37  ;;  %v660_v45 = vunpack.c.l.bf16 %v628_v39 }
 0x1df   :  { %v1038_v41 = vmul.f32 0.20019531, %v1006_v40  ;;  %v692_v51 = vmul.f32 0.20019531, %v660_v45 }
 0x1e0   :  { %v586_v42 = vpop.f32.mrf.mxu1  ;;  %v904_v43 = vpop.f32.mrf.mxu2 }
 0x1e1   :  { %v587_v46 = vadd.f32 %v1858_v55, %v586_v42  ;;  %v905_v47 = vadd.f32 %v1920_v27, %v904_v43  ;;  %v1134_v48 = vmax.f32 %v1006_v40, %v1038_v41  ;;  %v788_v58 = vmax.f32 %v660_v45, %v692_v51 }
 0x1e3   :  { %v629_v49 = vpack.c.bf16 %v587_v46, %v587_v46  ;;  %v1163_v50 = vpack.c.bf16 %v1134_v48, %v1133_v44  ;;  %v975_v36 = vpack.c.bf16 %v905_v47, %v905_v47 }
 0x1e5   :  { %v661_v52 = vunpack.c.l.bf16 %v629_v49  ;;  %1263 = vmatmul.bf16.gmra.mxu3 %v1163_v50  ;;  %v1007_v54 = vunpack.c.l.bf16 %v975_v36 }
 0x1e7   :  { %v693_v53 = vmul.f32 0.20019531, %v661_v52  ;;  %v1039_v0 = vmul.f32 0.20019531, %v1007_v54 }
 0x1e8   :  { %v589_v56 = vpop.f32.mrf.mxu1  ;;  %v906_v57 = vpop.f32.mrf.mxu2 }
 0x1e9   :  { %v789_v59 = vmax.f32 %v661_v52, %v693_v53  ;;  %v590_v60 = vadd.f32 %v1858_v55, %v589_v56  ;;  %v907_v61 = vadd.f32 %v1920_v27, %v906_v57  ;;  %v1135_v6 = vmax.f32 %v1007_v54, %v1039_v0 }
 0x1eb   :  { %v976_v62 = vpack.c.bf16 %v907_v61, %v907_v61  ;;  %v808_v63 = vpack.c.bf16 %v789_v59, %v788_v58  ;;  %v630_v1 = vpack.c.bf16 %v590_v60, %v590_v60 }
 0x1ed   :  { %v1008_v2 = vunpack.c.l.bf16 %v976_v62  ;;  %948 = vmatmul.bf16.gmra.mxu2 %v808_v63  ;;  %v662_v7 = vunpack.c.l.bf16 %v630_v1 }
 0x1ef   :  { %v1040_v3 = vmul.f32 0.20019531, %v1008_v2  ;;  %v694_v14 = vmul.f32 0.20019531, %v662_v7 }
 0x1f0   :  { %v591_v4 = vpop.f32.mrf.mxu1  ;;  %v909_v5 = vpop.f32.mrf.mxu2 }
 0x1f1   :  { %v592_v8 = vadd.f32 %v1858_v55, %v591_v4  ;;  %v910_v9 = vadd.f32 %v1920_v27, %v909_v5  ;;  %v1136_v10 = vmax.f32 %v1008_v2, %v1040_v3  ;;  %v790_v20 = vmax.f32 %v662_v7, %v694_v14 }
 0x1f3   :  { %v631_v11 = vpack.c.bf16 %v592_v8, %v592_v8  ;;  %v1164_v12 = vpack.c.bf16 %v1136_v10, %v1135_v6  ;;  %v977_v13 = vpack.c.bf16 %v910_v9, %v910_v9 }
 0x1f5   :  { %v663_v15 = vunpack.c.l.bf16 %v631_v11  ;;  %1268 = vmatmul.bf16.gmra.mxu3 %v1164_v12  ;;  %v1009_v17 = vunpack.c.l.bf16 %v977_v13 }
 0x1f7   :  { %v695_v16 = vmul.f32 0.20019531, %v663_v15  ;;  %v1041_v26 = vmul.f32 0.20019531, %v1009_v17 }
 0x1f8   :  { %v594_v18 = vpop.f32.mrf.mxu1  ;;  %v911_v19 = vpop.f32.mrf.mxu2 }
 0x1f9   :  { %v791_v21 = vmax.f32 %v663_v15, %v695_v16  ;;  %v595_v22 = vadd.f32 %v1858_v55, %v594_v18  ;;  %v912_v23 = vadd.f32 %v1920_v27, %v911_v19  ;;  %v1137_v33 = vmax.f32 %v1009_v17, %v1041_v26 }
 0x1fb   :  { %v978_v24 = vpack.c.bf16 %v912_v23, %v912_v23  ;;  %v809_v25 = vpack.c.bf16 %v791_v21, %v790_v20  ;;  %v632_v28 = vpack.c.bf16 %v595_v22, %v595_v22 }
 0x1fd   :  { %v1010_v29 = vunpack.c.l.bf16 %v978_v24  ;;  %953 = vmatmul.bf16.gmra.mxu2 %v809_v25  ;;  %v664_v34 = vunpack.c.l.bf16 %v632_v28 }
 0x1ff   :  { %v1042_v30 = vmul.f32 0.20019531, %v1010_v29  ;;  %v696_v42 = vmul.f32 0.20019531, %v664_v34 }
 0x200   :  { %v596_v31 = vpop.f32.mrf.mxu1  ;;  %v914_v32 = vpop.f32.mrf.mxu2 }
 0x201   :  { %v597_v35 = vadd.f32 %v1858_v55, %v596_v31  ;;  %v915_v37 = vadd.f32 %v1920_v27, %v914_v32  ;;  %v1138_v38 = vmax.f32 %v1010_v29, %v1042_v30  ;;  %v792_v48 = vmax.f32 %v664_v34, %v696_v42 }
 0x203   :  { %v633_v39 = vpack.c.bf16 %v597_v35, %v597_v35  ;;  %v1165_v40 = vpack.c.bf16 %v1138_v38, %v1137_v33  ;;  %v979_v41 = vpack.c.bf16 %v915_v37, %v915_v37 }
 0x205   :  { %v665_v43 = vunpack.c.l.bf16 %v633_v39  ;;  %1273 = vmatmul.bf16.gmra.mxu3 %v1165_v40  ;;  %v1011_v45 = vunpack.c.l.bf16 %v979_v41 }
 0x207   :  { %v697_v44 = vmul.f32 0.20019531, %v665_v43  ;;  %v1043_v53 = vmul.f32 0.20019531, %v1011_v45 }
 0x208   :  { %v599_v46 = vpop.f32.mrf.mxu1  ;;  %v916_v47 = vpop.f32.mrf.mxu2 }
 0x209   :  { %v793_v49 = vmax.f32 %v665_v43, %v697_v44  ;;  %v600_v50 = vadd.f32 %v1858_v55, %v599_v46  ;;  %v917_v36 = vadd.f32 %v1920_v27, %v916_v47  ;;  %v1139_v60 = vmax.f32 %v1011_v45, %v1043_v53 }
 0x20b   :  { %v980_v51 = vpack.c.bf16 %v917_v36, %v917_v36  ;;  %v810_v52 = vpack.c.bf16 %v793_v49, %v792_v48  ;;  %v634_v54 = vpack.c.bf16 %v600_v50, %v600_v50  ;;  %v1957_v50 = vld [vmem:[%s2108_s8] ss:$0 sm:$0xff] }
 0x20d   :  { %v1012_v56 = vunpack.c.l.bf16 %v980_v51  ;;  %958 = vmatmul.bf16.gmra.mxu2 %v810_v52  ;;  %v666_v61 = vunpack.c.l.bf16 %v634_v54 }
 0x20f   :  { %v1044_v57 = vmul.f32 0.20019531, %v1012_v56  ;;  %v698_v3 = vmul.f32 0.20019531, %v666_v61 }
 0x210   :  { %v601_v58 = vpop.f32.mrf.mxu1  ;;  %v919_v59 = vpop.f32.mrf.mxu2 }
 0x211   :  { %v602_v62 = vadd.f32 %v1858_v55, %v601_v58  ;;  %v920_v63 = vadd.f32 %v1920_v27, %v919_v59  ;;  %v1140_v0 = vmax.f32 %v1012_v56, %v1044_v57  ;;  %v794_v8 = vmax.f32 %v666_v61, %v698_v3 }
 0x213   :  { %v635_v1 = vpack.c.bf16 %v602_v62, %v602_v62  ;;  %v1166_v2 = vpack.c.bf16 %v1140_v0, %v1139_v60  ;;  %v981_v5 = vpack.c.bf16 %v920_v63, %v920_v63 }
 0x215   :  { %v667_v4 = vunpack.c.l.bf16 %v635_v1  ;;  %1278 = vmatmul.bf16.gmra.mxu3 %v1166_v2  ;;  %v1013_v10 = vunpack.c.l.bf16 %v981_v5 }
 0x217   :  { %v699_v6 = vmul.f32 0.20019531, %v667_v4  ;;  %v1045_v14 = vmul.f32 0.20019531, %v1013_v10 }
 0x218   :  { %v921_v7 = vpop.f32.mrf.mxu2 }
 0x219   :  { %v795_v9 = vmax.f32 %v667_v4, %v699_v6  ;;  %v922_v11 = vadd.f32 %v1920_v27, %v921_v7  ;;  %v1141_v18 = vmax.f32 %v1013_v10, %v1045_v14 }
 0x21b   :  { %v982_v12 = vpack.c.bf16 %v922_v11, %v922_v11  ;;  %v811_v13 = vpack.c.bf16 %v795_v9, %v794_v8 }
 0x21d   :  { %v1014_v55 = vunpack.c.l.bf16 %v982_v12  ;;  %963 = vmatmul.bf16.gmra.mxu2 %v811_v13 }
 0x21f   :  { %v1046_v15 = vmul.f32 0.20019531, %v1014_v55 }
 0x220   :  { %v924_v16 = vpop.f32.mrf.mxu2 }
 0x221   :  { %v925_v17 = vadd.f32 %v1920_v27, %v924_v16  ;;  %v1142_v19 = vmax.f32 %v1014_v55, %v1046_v15 }
 0x223   :  { %v1167_v20 = vpack.c.bf16 %v1142_v19, %v1141_v18  ;;  %v983_v21 = vpack.c.bf16 %v925_v17, %v925_v17 }
 0x225   :  { %1283 = vmatmul.bf16.gmra.mxu3 %v1167_v20  ;;  %v1015_v23 = vunpack.c.l.bf16 %v983_v21 }
 0x227   :  { %v1047_v26 = vmul.f32 0.20019531, %v1015_v23 }
 0x228   :  { %v926_v22 = vpop.f32.mrf.mxu2 }
 0x229   :  { %v927_v24 = vadd.f32 %v1920_v27, %v926_v22  ;;  %v1143_v32 = vmax.f32 %v1015_v23, %v1047_v26 }
 0x22b   :  { %v984_v25 = vpack.c.bf16 %v927_v24, %v927_v24 }
 0x22d   :  { %v1016_v28 = vunpack.c.l.bf16 %v984_v25 }
 0x22f   :  { %v1048_v29 = vmul.f32 0.20019531, %v1016_v28 }
 0x230   :  { %v929_v30 = vpop.f32.mrf.mxu2 }
 0x231   :  { %v930_v31 = vadd.f32 %v1920_v27, %v929_v30  ;;  %v1144_v33 = vmax.f32 %v1016_v28, %v1048_v29 }
 0x233   :  { %v1168_v34 = vpack.c.bf16 %v1144_v33, %v1143_v32  ;;  %v985_v35 = vpack.c.bf16 %v930_v31, %v930_v31 }
 0x235   :  { %1288 = vmatmul.bf16.gmra.mxu3 %v1168_v34  ;;  %v1017_v38 = vunpack.c.l.bf16 %v985_v35 }
 0x237   :  { %v1049_v41 = vmul.f32 0.20019531, %v1017_v38 }
 0x238   :  { %v931_v37 = vpop.f32.mrf.mxu2 }
 0x239   :  { %v932_v39 = vadd.f32 %v1920_v27, %v931_v37  ;;  %v1145_v46 = vmax.f32 %v1017_v38, %v1049_v41 }
 0x23b   :  { %v986_v40 = vpack.c.bf16 %v932_v39, %v932_v39 }
 0x23d   :  { %v1018_v42 = vunpack.c.l.bf16 %v986_v40 }
 0x23f   :  { %v1050_v43 = vmul.f32 0.20019531, %v1018_v42 }
 0x240   :  { %v934_v44 = vpop.f32.mrf.mxu2 }
 0x241   :  { %v935_v45 = vadd.f32 %v1920_v27, %v934_v44  ;;  %v1146_v47 = vmax.f32 %v1018_v42, %v1050_v43 }
 0x243   :  { %v1169_v48 = vpack.c.bf16 %v1146_v47, %v1145_v46  ;;  %v987_v49 = vpack.c.bf16 %v935_v45, %v935_v45 }
 0x245   :  { %1293 = vmatmul.bf16.gmra.mxu3 %v1169_v48  ;;  %v1019_v52 = vunpack.c.l.bf16 %v987_v49 }
 0x247   :  { %v1051_v57 = vmul.f32 0.20019531, %v1019_v52 }
 0x248   :  { %v936_v36 = vpop.f32.mrf.mxu2  ;;  %v1254_v51 = vpop.f32.mrf.mxu3 }
 0x249   :  { %v937_v53 = vadd.f32 %v1920_v27, %v936_v36  ;;  %v1255_v54 = vadd.f32 %v1957_v50, %v1254_v51  ;;  %v1147_v1 = vmax.f32 %v1019_v52, %v1051_v57 }
 0x24b   :  { %v988_v56 = vpack.c.bf16 %v937_v53, %v937_v53  ;;  %1552 = vtanh.f32 %v1255_v54 }
 0x24d   :  { %v1020_v58 = vunpack.c.l.bf16 %v988_v56 }
 0x24f   :  { %v1052_v59 = vmul.f32 0.20019531, %v1020_v58 }
 0x250   :  { %v939_v60 = vpop.f32.mrf.mxu2  ;;  %v1256_v61 = vpop.f32.mrf.mxu3 }
 0x251   :  { %v1553_v62 = vpop.eup %1552  ;;  %v940_v63 = vadd.f32 %v1920_v27, %v939_v60  ;;  %v1257_v0 = vadd.f32 %v1957_v50, %v1256_v61  ;;  %v1148_v2 = vmax.f32 %v1020_v58, %v1052_v59 }
 0x252   :  { %1366 = vst [vmem:[%s2109_s9] sm:$0xff] %v1553_v62 }
 0x253   :  { %1554 = vtanh.f32 %v1257_v0  ;;  %v1170_v3 = vpack.c.bf16 %v1148_v2, %v1147_v1  ;;  %v989_v4 = vpack.c.bf16 %v940_v63, %v940_v63 }
 0x255   :  { %1298 = vmatmul.bf16.gmra.mxu3 %v1170_v3  ;;  %v1021_v8 = vunpack.c.l.bf16 %v989_v4 }
 0x257   :  { %v1053_v12 = vmul.f32 0.20019531, %v1021_v8 }
 0x258   :  { %v941_v5 = vpop.f32.mrf.mxu2  ;;  %v1259_v6 = vpop.f32.mrf.mxu3 }
 0x259   :  { %v1555_v7 = vpop.eup %1554  ;;  %v942_v9 = vadd.f32 %v1920_v27, %v941_v5  ;;  %v1260_v10 = vadd.f32 %v1957_v50, %v1259_v6  ;;  %v1149_v19 = vmax.f32 %v1021_v8, %v1053_v12 }
 0x25a   :  { %1367 = vst [vmem:[%s2109_s9 + $0x8] sm:$0xff] %v1555_v7 }
 0x25b   :  { %v990_v11 = vpack.c.bf16 %v942_v9, %v942_v9  ;;  %1556 = vtanh.f32 %v1260_v10 }
 0x25d   :  { %v1022_v13 = vunpack.c.l.bf16 %v990_v11 }
 0x25f   :  { %v1054_v14 = vmul.f32 0.20019531, %v1022_v13 }
 0x260   :  { %v944_v55 = vpop.f32.mrf.mxu2  ;;  %v1261_v15 = vpop.f32.mrf.mxu3 }
 0x261   :  { %v1557_v16 = vpop.eup %1556  ;;  %v945_v17 = vadd.f32 %v1920_v27, %v944_v55  ;;  %v1262_v18 = vadd.f32 %v1957_v50, %v1261_v15  ;;  %v1150_v20 = vmax.f32 %v1022_v13, %v1054_v14 }
 0x262   :  { %1368 = vst [vmem:[%s2109_s9 + $0x10] sm:$0xff] %v1557_v16 }
 0x263   :  { %1558 = vtanh.f32 %v1262_v18  ;;  %v1171_v21 = vpack.c.bf16 %v1150_v20, %v1149_v19  ;;  %v991_v22 = vpack.c.bf16 %v945_v17, %v945_v17 }
 0x265   :  { %1303 = vmatmul.bf16.gmra.mxu3 %v1171_v21  ;;  %v1023_v26 = vunpack.c.l.bf16 %v991_v22 }
 0x267   :  { %v1055_v31 = vmul.f32 0.20019531, %v1023_v26 }
 0x268   :  { %v946_v23 = vpop.f32.mrf.mxu2  ;;  %v1264_v24 = vpop.f32.mrf.mxu3 }
 0x269   :  { %v1559_v25 = vpop.eup %1558  ;;  %v947_v28 = vadd.f32 %v1920_v27, %v946_v23  ;;  %v1265_v29 = vadd.f32 %v1957_v50, %v1264_v24  ;;  %v1151_v40 = vmax.f32 %v1023_v26, %v1055_v31 }
 0x26a   :  { %1369 = vst [vmem:[%s2109_s9 + $0x18] sm:$0xff] %v1559_v25 }
 0x26b   :  { %v992_v30 = vpack.c.bf16 %v947_v28, %v947_v28  ;;  %1560 = vtanh.f32 %v1265_v29 }
 0x26d   :  { %v1024_v32 = vunpack.c.l.bf16 %v992_v30 }
 0x26f   :  { %v1056_v33 = vmul.f32 0.20019531, %v1024_v32 }
 0x270   :  { %v949_v34 = vpop.f32.mrf.mxu2  ;;  %v1266_v35 = vpop.f32.mrf.mxu3 }
 0x271   :  { %v1561_v37 = vpop.eup %1560  ;;  %v950_v38 = vadd.f32 %v1920_v27, %v949_v34  ;;  %v1267_v39 = vadd.f32 %v1957_v50, %v1266_v35  ;;  %v1152_v41 = vmax.f32 %v1024_v32, %v1056_v33 }
 0x272   :  { %1370 = vst [vmem:[%s2109_s9 + $0x20] sm:$0xff] %v1561_v37 }
 0x273   :  { %1562 = vtanh.f32 %v1267_v39  ;;  %v1172_v42 = vpack.c.bf16 %v1152_v41, %v1151_v40  ;;  %v993_v43 = vpack.c.bf16 %v950_v38, %v950_v38 }
 0x275   :  { %1308 = vmatmul.bf16.gmra.mxu3 %v1172_v42  ;;  %v1025_v47 = vunpack.c.l.bf16 %v993_v43 }
 0x277   :  { %v1057_v51 = vmul.f32 0.20019531, %v1025_v47 }
 0x278   :  { %v951_v44 = vpop.f32.mrf.mxu2  ;;  %v1269_v45 = vpop.f32.mrf.mxu3 }
 0x279   :  { %v1563_v46 = vpop.eup %1562  ;;  %v952_v48 = vadd.f32 %v1920_v27, %v951_v44  ;;  %v1270_v49 = vadd.f32 %v1957_v50, %v1269_v45  ;;  %v1153_v58 = vmax.f32 %v1025_v47, %v1057_v51 }
 0x27a   :  { %1371 = vst [vmem:[%s2109_s9 + $0x28] sm:$0xff] %v1563_v46 }
 0x27b   :  { %v994_v36 = vpack.c.bf16 %v952_v48, %v952_v48  ;;  %1564 = vtanh.f32 %v1270_v49 }
 0x27d   :  { %v1026_v52 = vunpack.c.l.bf16 %v994_v36 }
 0x27f   :  { %v1058_v53 = vmul.f32 0.20019531, %v1026_v52 }
 0x280   :  { %v954_v54 = vpop.f32.mrf.mxu2  ;;  %v1271_v56 = vpop.f32.mrf.mxu3 }
 0x281   :  { %v1565_v57 = vpop.eup %1564  ;;  %v1154_v59 = vmax.f32 %v1026_v52, %v1058_v53  ;;  %v955_v60 = vadd.f32 %v1920_v27, %v954_v54  ;;  %v1272_v61 = vadd.f32 %v1957_v50, %v1271_v56 }
 0x282   :  { %1372 = vst [vmem:[%s2109_s9 + $0x30] sm:$0xff] %v1565_v57 }
 0x283   :  { %1566 = vtanh.f32 %v1272_v61  ;;  %v1173_v62 = vpack.c.bf16 %v1154_v59, %v1153_v58  ;;  %v995_v63 = vpack.c.bf16 %v955_v60, %v955_v60 }
 0x285   :  { %1313 = vmatmul.bf16.gmra.mxu3 %v1173_v62  ;;  %v1027_v3 = vunpack.c.l.bf16 %v995_v63 }
 0x287   :  { %v1059_v7 = vmul.f32 0.20019531, %v1027_v3 }
 0x288   :  { %v956_v0 = vpop.f32.mrf.mxu2  ;;  %v1274_v1 = vpop.f32.mrf.mxu3 }
 0x289   :  { %v1567_v2 = vpop.eup %1566  ;;  %v957_v4 = vadd.f32 %v1920_v27, %v956_v0  ;;  %v1275_v5 = vadd.f32 %v1957_v50, %v1274_v1  ;;  %v1155_v13 = vmax.f32 %v1027_v3, %v1059_v7 }
 0x28a   :  { %1373 = vst [vmem:[%s2109_s9 + $0x38] sm:$0xff] %v1567_v2 }
 0x28b   :  { %v996_v6 = vpack.c.bf16 %v957_v4, %v957_v4  ;;  %1568 = vtanh.f32 %v1275_v5 }
 0x28d   :  { %v1028_v8 = vunpack.c.l.bf16 %v996_v6 }
 0x28f   :  { %v1060_v9 = vmul.f32 0.20019531, %v1028_v8 }
 0x290   :  { %v959_v10 = vpop.f32.mrf.mxu2  ;;  %v1276_v11 = vpop.f32.mrf.mxu3 }
 0x291   :  { %v1569_v12 = vpop.eup %1568  ;;  %v1156_v14 = vmax.f32 %v1028_v8, %v1060_v9  ;;  %v960_v55 = vadd.f32 %v1920_v27, %v959_v10  ;;  %v1277_v15 = vadd.f32 %v1957_v50, %v1276_v11 }
 0x292   :  { %1374 = vst [vmem:[%s2109_s9 + $0x40] sm:$0xff] %v1569_v12 }
 0x293   :  { %1570 = vtanh.f32 %v1277_v15  ;;  %v1174_v16 = vpack.c.bf16 %v1156_v14, %v1155_v13  ;;  %v997_v17 = vpack.c.bf16 %v960_v55, %v960_v55 }
 0x295   :  { %1318 = vmatmul.bf16.gmra.mxu3 %v1174_v16  ;;  %v1029_v21 = vunpack.c.l.bf16 %v997_v17 }
 0x297   :  { %v1061_v25 = vmul.f32 0.20019531, %v1029_v21 }
 0x298   :  { %v961_v18 = vpop.f32.mrf.mxu2  ;;  %v1279_v19 = vpop.f32.mrf.mxu3 }
 0x299   :  { %v1571_v20 = vpop.eup %1570  ;;  %v962_v22 = vadd.f32 %v1920_v27, %v961_v18  ;;  %v1280_v23 = vadd.f32 %v1957_v50, %v1279_v19  ;;  %v1157_v32 = vmax.f32 %v1029_v21, %v1061_v25 }
 0x29a   :  { %1375 = vst [vmem:[%s2109_s9 + $0x48] sm:$0xff] %v1571_v20 }
 0x29b   :  { %v998_v24 = vpack.c.bf16 %v962_v22, %v962_v22  ;;  %1572 = vtanh.f32 %v1280_v23 }
 0x29d   :  { %v1030_v26 = vunpack.c.l.bf16 %v998_v24 }
 0x29f   :  { %v1062_v28 = vmul.f32 0.20019531, %v1030_v26 }
 0x2a0   :  { %v964_v29 = vpop.f32.mrf.mxu2  ;;  %v1281_v30 = vpop.f32.mrf.mxu3 }
 0x2a1   :  { %v1573_v31 = vpop.eup %1572  ;;  %v1158_v33 = vmax.f32 %v1030_v26, %v1062_v28  ;;  %v965_v34 = vadd.f32 %v1920_v27, %v964_v29  ;;  %v1282_v35 = vadd.f32 %v1957_v50, %v1281_v30 }
 0x2a2   :  { %1376 = vst [vmem:[%s2109_s9 + $0x50] sm:$0xff] %v1573_v31 }
 0x2a3   :  { %1574 = vtanh.f32 %v1282_v35  ;;  %v1175_v37 = vpack.c.bf16 %v1158_v33, %v1157_v32  ;;  %v999_v38 = vpack.c.bf16 %v965_v34, %v965_v34 }
 0x2a5   :  { %1323 = vmatmul.bf16.gmra.mxu3 %v1175_v37  ;;  %v1031_v42 = vunpack.c.l.bf16 %v999_v38 }
 0x2a7   :  { %v1063_v46 = vmul.f32 0.20019531, %v1031_v42 }
 0x2a8   :  { %v966_v39 = vpop.f32.mrf.mxu2  ;;  %v1284_v40 = vpop.f32.mrf.mxu3 }
 0x2a9   :  { %v1575_v41 = vpop.eup %1574  ;;  %v967_v43 = vadd.f32 %v1920_v27, %v966_v39  ;;  %v1285_v44 = vadd.f32 %v1957_v50, %v1284_v40  ;;  %v1159_v51 = vmax.f32 %v1031_v42, %v1063_v46 }
 0x2aa   :  { %1377 = vst [vmem:[%s2109_s9 + $0x58] sm:$0xff] %v1575_v41 }
 0x2ab   :  { %v1000_v45 = vpack.c.bf16 %v967_v43, %v967_v43  ;;  %1576 = vtanh.f32 %v1285_v44 }
 0x2ad   :  { %v1032_v47 = vunpack.c.l.bf16 %v1000_v45 }
 0x2af   :  { %v1064_v48 = vmul.f32 0.20019531, %v1032_v47 }
 0x2b0   :  { %v1286_v49 = vpop.f32.mrf.mxu3 }
 0x2b1   :  { %v1577_v36 = vpop.eup %1576  ;;  %v1160_v52 = vmax.f32 %v1032_v47, %v1064_v48  ;;  %v1287_v53 = vadd.f32 %v1957_v50, %v1286_v49 }
 0x2b2   :  { %1378 = vst [vmem:[%s2109_s9 + $0x60] sm:$0xff] %v1577_v36 }
 0x2b3   :  { %1578 = vtanh.f32 %v1287_v53  ;;  %v1176_v27 = vpack.c.bf16 %v1160_v52, %v1159_v51 }
 0x2b5   :  { %1328 = vmatmul.bf16.gmra.mxu3 %v1176_v27 }
 0x2b8   :  { %v1289_v54 = vpop.f32.mrf.mxu3 }
 0x2b9   :  { %v1579_v56 = vpop.eup %1578  ;;  %v1290_v57 = vadd.f32 %v1957_v50, %v1289_v54 }
 0x2ba   :  { %1379 = vst [vmem:[%s2109_s9 + $0x68] sm:$0xff] %v1579_v56 }
 0x2bb   :  { %1580 = vtanh.f32 %v1290_v57 }
 0x2c0   :  { %v1291_v58 = vpop.f32.mrf.mxu3 }
 0x2c1   :  { %v1581_v59 = vpop.eup %1580  ;;  %v1292_v60 = vadd.f32 %v1957_v50, %v1291_v58 }
 0x2c2   :  { %1380 = vst [vmem:[%s2109_s9 + $0x70] sm:$0xff] %v1581_v59 }
 0x2c3   :  { %1582 = vtanh.f32 %v1292_v60 }
 0x2c8   :  { %v1294_v61 = vpop.f32.mrf.mxu3 }
 0x2c9   :  { %v1583_v62 = vpop.eup %1582  ;;  %v1295_v63 = vadd.f32 %v1957_v50, %v1294_v61 }
 0x2ca   :  { %1381 = vst [vmem:[%s2109_s9 + $0x78] sm:$0xff] %v1583_v62 }
 0x2cb   :  { %1584 = vtanh.f32 %v1295_v63 }
 0x2d0   :  { %v1296_v0 = vpop.f32.mrf.mxu3 }
 0x2d1   :  { %v1585_v1 = vpop.eup %1584  ;;  %v1297_v2 = vadd.f32 %v1957_v50, %v1296_v0 }
 0x2d2   :  { %1382 = vst [vmem:[%s2109_s9 + $0x80] sm:$0xff] %v1585_v1 }
 0x2d3   :  { %1586 = vtanh.f32 %v1297_v2 }
 0x2d8   :  { %v1299_v3 = vpop.f32.mrf.mxu3 }
 0x2d9   :  { %v1587_v4 = vpop.eup %1586  ;;  %v1300_v5 = vadd.f32 %v1957_v50, %v1299_v3 }
 0x2da   :  { %1383 = vst [vmem:[%s2109_s9 + $0x88] sm:$0xff] %v1587_v4 }
 0x2db   :  { %1588 = vtanh.f32 %v1300_v5 }
 0x2e0   :  { %v1301_v6 = vpop.f32.mrf.mxu3 }
 0x2e1   :  { %v1589_v7 = vpop.eup %1588  ;;  %v1302_v8 = vadd.f32 %v1957_v50, %v1301_v6 }
 0x2e2   :  { %1384 = vst [vmem:[%s2109_s9 + $0x90] sm:$0xff] %v1589_v7 }
 0x2e3   :  { %1590 = vtanh.f32 %v1302_v8 }
 0x2e8   :  { %v1304_v9 = vpop.f32.mrf.mxu3 }
 0x2e9   :  { %v1591_v10 = vpop.eup %1590  ;;  %v1305_v11 = vadd.f32 %v1957_v50, %v1304_v9 }
 0x2ea   :  { %1385 = vst [vmem:[%s2109_s9 + $0x98] sm:$0xff] %v1591_v10 }
 0x2eb   :  { %1592 = vtanh.f32 %v1305_v11 }
 0x2f0   :  { %v1306_v12 = vpop.f32.mrf.mxu3 }
 0x2f1   :  { %v1593_v13 = vpop.eup %1592  ;;  %v1307_v14 = vadd.f32 %v1957_v50, %v1306_v12 }
 0x2f2   :  { %1386 = vst [vmem:[%s2109_s9 + $0xa0] sm:$0xff] %v1593_v13 }
 0x2f3   :  { %1594 = vtanh.f32 %v1307_v14 }
 0x2f8   :  { %v1309_v55 = vpop.f32.mrf.mxu3 }
 0x2f9   :  { %v1595_v15 = vpop.eup %1594  ;;  %v1310_v16 = vadd.f32 %v1957_v50, %v1309_v55 }
 0x2fa   :  { %1387 = vst [vmem:[%s2109_s9 + $0xa8] sm:$0xff] %v1595_v15 }
 0x2fb   :  { %1596 = vtanh.f32 %v1310_v16 }
 0x300   :  { %v1311_v17 = vpop.f32.mrf.mxu3 }
 0x301   :  { %v1597_v18 = vpop.eup %1596  ;;  %v1312_v19 = vadd.f32 %v1957_v50, %v1311_v17 }
 0x302   :  { %1388 = vst [vmem:[%s2109_s9 + $0xb0] sm:$0xff] %v1597_v18 }
 0x303   :  { %1598 = vtanh.f32 %v1312_v19 }
 0x308   :  { %v1314_v20 = vpop.f32.mrf.mxu3 }
 0x309   :  { %v1599_v21 = vpop.eup %1598  ;;  %v1315_v22 = vadd.f32 %v1957_v50, %v1314_v20 }
 0x30a   :  { %1389 = vst [vmem:[%s2109_s9 + $0xb8] sm:$0xff] %v1599_v21 }
 0x30b   :  { %1600 = vtanh.f32 %v1315_v22 }
 0x310   :  { %v1316_v23 = vpop.f32.mrf.mxu3 }
 0x311   :  { %v1601_v24 = vpop.eup %1600  ;;  %v1317_v25 = vadd.f32 %v1957_v50, %v1316_v23 }
 0x312   :  { %1390 = vst [vmem:[%s2109_s9 + $0xc0] sm:$0xff] %v1601_v24 }
 0x313   :  { %1602 = vtanh.f32 %v1317_v25 }
 0x318   :  { %v1319_v26 = vpop.f32.mrf.mxu3 }
 0x319   :  { %v1603_v28 = vpop.eup %1602  ;;  %v1320_v29 = vadd.f32 %v1957_v50, %v1319_v26 }
 0x31a   :  { %1391 = vst [vmem:[%s2109_s9 + $0xc8] sm:$0xff] %v1603_v28 }
 0x31b   :  { %1604 = vtanh.f32 %v1320_v29 }
 0x320   :  { %v1321_v30 = vpop.f32.mrf.mxu3 }
 0x321   :  { %v1605_v31 = vpop.eup %1604  ;;  %v1322_v32 = vadd.f32 %v1957_v50, %v1321_v30 }
 0x322   :  { %1392 = vst [vmem:[%s2109_s9 + $0xd0] sm:$0xff] %v1605_v31 }
 0x323   :  { %1606 = vtanh.f32 %v1322_v32 }
 0x328   :  { %v1324_v33 = vpop.f32.mrf.mxu3 }
 0x329   :  { %v1607_v34 = vpop.eup %1606  ;;  %v1325_v35 = vadd.f32 %v1957_v50, %v1324_v33 }
 0x32a   :  { %1393 = vst [vmem:[%s2109_s9 + $0xd8] sm:$0xff] %v1607_v34 }
 0x32b   :  { %1608 = vtanh.f32 %v1325_v35 }
 0x330   :  { %v1326_v37 = vpop.f32.mrf.mxu3 }
 0x331   :  { %v1609_v38 = vpop.eup %1608  ;;  %v1327_v39 = vadd.f32 %v1957_v50, %v1326_v37 }
 0x332   :  { %1394 = vst [vmem:[%s2109_s9 + $0xe0] sm:$0xff] %v1609_v38 }
 0x333   :  { %1610 = vtanh.f32 %v1327_v39 }
 0x338   :  { %v1329_v40 = vpop.f32.mrf.mxu3 }
 0x339   :  { %v1611_v41 = vpop.eup %1610  ;;  %v1330_v42 = vadd.f32 %v1957_v50, %v1329_v40 }
 0x33a   :  { %1395 = vst [vmem:[%s2109_s9 + $0xe8] sm:$0xff] %v1611_v41 }
 0x33b   :  { %1612 = vtanh.f32 %v1330_v42 }
 0x340   :  { %v1331_v43 = vpop.f32.mrf.mxu3 }
 0x341   :  { %v1613_v44 = vpop.eup %1612  ;;  %v1332_v45 = vadd.f32 %v1957_v50, %v1331_v43 }
 0x342   :  { %1396 = vst [vmem:[%s2109_s9 + $0xf0] sm:$0xff] %v1613_v44 }
 0x343   :  { %1614 = vtanh.f32 %v1332_v45 }
 0x349   :  { %v1615_v46 = vpop.eup %1614 }
 0x34a   :  { %1397 = vst [vmem:[%s2109_s9 + $0xf8] sm:$0xff] %v1615_v46 }

</bundles_post_ra>
